<compile_context>
chip_gen: v6e
topology: v6e:2x2x1
jax: 0.10.0
libtpu: 0.0.40
codegen_flags: <defaults>
</compile_context>

<pallas_src>
import math
import functools

import jax
import jax.numpy as jnp
from jax import lax
from jax.experimental import pallas as pl
from jax.experimental.pallas import tpu as pltpu


def _akt_layer_kernel(
    q_ref, k_ref, v_ref, gam_ref,
    mmask_ref, amask_ref, poseff_ref, rest_ref, zpad_ref,
    wq_ref, bq_ref, wk_ref, bk_ref, wv_ref, bv_ref, wo_ref, bo_ref,
    ln1g_ref, ln1b_ref, w1_ref, b1_ref, w2_ref, b2_ref, ln2g_ref, ln2b_ref,
    out_ref,
    *, n_heads, d_k, b_tile, seq, apply_pos, ln_eps):
    rows = b_tile * seq
    d_model = n_heads * d_k

    xq = q_ref[...]                           # (rows, d_model) token block
    xk = k_ref[...]
    xv = v_ref[...]

    # Input projections: x @ W.T + b (weights pre-transposed wrapper-side;
    # 1/sqrt(d_k) already folded into wq/bq).
    qp = jnp.dot(xq, wq_ref[...], preferred_element_type=jnp.float32) + bq_ref[...]
    kp = jnp.dot(xk, wk_ref[...], preferred_element_type=jnp.float32) + bk_ref[...]
    vp = jnp.dot(xv, wv_ref[...], preferred_element_type=jnp.float32) + bv_ref[...]

    # Host-precomputed (seq, seq) constants, broadcast once over the batch tile.
    mmask = mmask_ref[...][None]              # {0,1} attend mask
    amask = amask_ref[...][None]              # 0 / -1e32 additive mask
    poseff = poseff_ref[...][None]            # |key_idx - query_idx|
    zpad = zpad_ref[...][None]                # zero_pad row mask (all ones if off)
    rest_b = jnp.broadcast_to(rest_ref[...], (b_tile, seq, seq))  # L[k,j]=1 iff k>j
    gam = gam_ref[...]                        # (1, n_heads) = -softplus(gamma)
    wo = wo_ref[...]                          # (d_model, d_model)

    def softmax_lastdim(s):
        m = jnp.max(s, axis=-1, keepdims=True)
        e = jnp.exp(s - m)
        return e * pl.reciprocal(jnp.sum(e, axis=-1, keepdims=True), approx=True)

    proj = jnp.zeros((rows, d_model), jnp.float32)
    for h in range(n_heads):
        sl = slice(h * d_k, (h + 1) * d_k)
        qh = qp[:, sl].reshape(b_tile, seq, d_k)
        kh = kp[:, sl].reshape(b_tile, seq, d_k)
        vh = vp[:, sl].reshape(b_tile, seq, d_k)

        # Scores (already scaled by 1/sqrt(d_k) through the folded Wq).
        scores = jnp.einsum("bqd,bkd->bqk", qh, kh,
                            preferred_element_type=jnp.float32)

        # AKT distance term: softmax of the UNMASKED scores (faithful to the
        # reference, whose masked_fill result is discarded), masked
        # multiplicatively; (total - cumsum) is one matmul against the
        # strictly-lower-triangular ones matrix.
        p = softmax_lastdim(scores) * mmask
        rest = jnp.einsum("bqk,bkj->bqj", p, rest_b,
                          preferred_element_type=jnp.float32)
        dist = jnp.sqrt(jnp.maximum(rest * poseff, 0.0))
        gam_h = gam[0:1, h:h + 1].reshape(1, 1, 1)
        total_effect = jnp.clip(jnp.exp(dist * gam_h), 1e-5, 1e5)

        attn = softmax_lastdim(scores * total_effect + amask) * zpad
        # TODO(synk): nn.Dropout on the attention weights is identity in eval.

        out_h = jnp.einsum("bqk,bkd->bqd", attn, vh,
                           preferred_element_type=jnp.float32)
        # Fold the head straight into the output projection (no concat scratch).
        proj = proj + jnp.dot(out_h.reshape(rows, d_k), wo[sl, :],
                              preferred_element_type=jnp.float32)

    attn_out = proj + bo_ref[...]

    def layer_norm(x, g, b):
        mu = jnp.mean(x, axis=-1, keepdims=True)
        xc = x - mu
        var = jnp.mean(xc * xc, axis=-1, keepdims=True)
        return xc * lax.rsqrt(var + ln_eps) * g + b

    # residual + LayerNorm1 (dropout1 identity)
    x = layer_norm(xq + attn_out, ln1g_ref[...], ln1b_ref[...])

    if apply_pos:
        hdn = jnp.maximum(
            jnp.dot(x, w1_ref[...], preferred_element_type=jnp.float32) + b1_ref[...],
            0.0)
        ffn = jnp.dot(hdn, w2_ref[...], preferred_element_type=jnp.float32) + b2_ref[...]
        x = layer_norm(x + ffn, ln2g_ref[...], ln2b_ref[...])

    out_ref[...] = x.astype(out_ref.dtype)


def transformer_layer(mask_flag, query, key, values, params, *,
                      n_heads, d_k, d_ff, b_tile=2, apply_pos=True,
                      ln_eps=1e-5):
    """mask_flag is the int `mask` of TransformerLayer.forward (0 or 1)."""
    bs, seq, d_model = query.shape
    assert d_model == n_heads * d_k
    assert bs % b_tile == 0
    assert (b_tile * seq) % 8 == 0
    n_tiles = bs // b_tile
    rows = b_tile * seq
    zero_pad = (mask_flag == 0)

    # Mask-derived constants (host side, VMEM resident across the grid).
    r = jnp.arange(seq)
    # src_mask[i, j] = 1 iff j < i + mask_flag  (== (triu(ones, k=mask_flag) == 0))
    mult_mask = (r[None, :] < r[:, None] + mask_flag).astype(jnp.float32)
    add_mask = (mult_mask - 1.0) * 1e32                       # 0 where attend, -1e32 where masked
    pos_eff = jnp.abs(r[None, :] - r[:, None]).astype(jnp.float32)
    rest_mat = (r[:, None] > r[None, :]).astype(jnp.float32)  # strictly-lower ones
    zp_rows = (r >= (1 if zero_pad else 0)).astype(jnp.float32)
    zp_mask = jnp.tile(zp_rows[:, None], (1, seq))

    # Fold 1/sqrt(d_k) into the Q projection; stable -softplus(gamma) host-side.
    scale = 1.0 / math.sqrt(d_k)
    wq_t = params["wq_t"] * scale
    bq = params["bq"] * scale
    neg_sp_gamma = -jax.nn.softplus(params["gammas"]).reshape(1, n_heads)

    # Token-flattened, HBM-contiguous 2-D blocks.
    q2 = query.reshape(bs * seq, d_model)
    k2 = key.reshape(bs * seq, d_model)
    v2 = values.reshape(bs * seq, d_model)

    tok_spec = pl.BlockSpec((rows, d_model), lambda b: (b, 0))

    def const_spec(shape):
        return pl.BlockSpec(shape, lambda b: (0, 0))

    in_specs = [
        tok_spec, tok_spec, tok_spec,                               # q, k, v tokens
        const_spec((1, n_heads)),                                   # -softplus(gamma)
        const_spec((seq, seq)), const_spec((seq, seq)),             # mult mask, add mask
        const_spec((seq, seq)), const_spec((seq, seq)),             # pos_eff, rest_mat
        const_spec((seq, seq)),                                     # zero_pad mask
        const_spec((d_model, d_model)), const_spec((1, d_model)),   # Wq.T (scaled), bq
        const_spec((d_model, d_model)), const_spec((1, d_model)),   # Wk.T, bk
        const_spec((d_model, d_model)), const_spec((1, d_model)),   # Wv.T, bv
        const_spec((d_model, d_model)), const_spec((1, d_model)),   # Wo.T, bo
        const_spec((1, d_model)), const_spec((1, d_model)),         # ln1 gamma, beta
        const_spec((d_model, d_ff)), const_spec((1, d_ff)),         # W1.T, b1
        const_spec((d_ff, d_model)), const_spec((1, d_model)),      # W2.T, b2
        const_spec((1, d_model)), const_spec((1, d_model)),         # ln2 gamma, beta
    ]

    kernel = functools.partial(_akt_layer_kernel, n_heads=n_heads, d_k=d_k,
                               b_tile=b_tile, seq=seq, apply_pos=apply_pos,
                               ln_eps=ln_eps)

    out2 = pl.pallas_call(
        kernel,
        out_shape=jax.ShapeDtypeStruct((bs * seq, d_model), query.dtype),
        grid_spec=pltpu.PrefetchScalarGridSpec(
            num_scalar_prefetch=0,
            grid=(n_tiles,),
            in_specs=in_specs,
            out_specs=pl.BlockSpec((rows, d_model), lambda b: (b, 0)),
        ),
        compiler_params=pltpu.CompilerParams(
            dimension_semantics=("parallel",)),
    )(q2, k2, v2, neg_sp_gamma,
      mult_mask, add_mask, pos_eff, rest_mat, zp_mask,
      wq_t, bq, params["wk_t"], params["bk"], params["wv_t"], params["bv"],
      params["wo_t"], params["bo"],
      params["ln1_g"], params["ln1_b"],
      params["w1_t"], params["b1"], params["w2_t"], params["b2"],
      params["ln2_g"], params["ln2_b"])

    return out2.reshape(bs, seq, d_model)


def reference_transformer_layer(mask_flag, query, key, values, params, *,
                                n_heads, d_k, apply_pos=True, ln_eps=1e-5):
    """Pure-JAX transcription of the PyTorch TransformerLayer.forward (eval)."""
    bs, seq, d_model = query.shape
    zero_pad = (mask_flag == 0)
    nopeek = jnp.triu(jnp.ones((seq, seq), jnp.float32), k=mask_flag)
    src_mask = (nopeek == 0)

    def lin(x, wt, b):
        return x @ wt + b

    qp = lin(query, params["wq_t"], params["bq"]).reshape(bs, seq, n_heads, d_k).transpose(0, 2, 1, 3)
    kp = lin(key, params["wk_t"], params["bk"]).reshape(bs, seq, n_heads, d_k).transpose(0, 2, 1, 3)
    vp = lin(values, params["wv_t"], params["bv"]).reshape(bs, seq, n_heads, d_k).transpose(0, 2, 1, 3)

    scores = jnp.einsum("bhqd,bhkd->bhqk", qp, kp) / math.sqrt(d_k)
    mask4 = src_mask[None, None]
    scores_ = jax.nn.softmax(scores, axis=-1) * mask4.astype(jnp.float32)
    distcum = jnp.cumsum(scores_, axis=-1)
    disttotal = jnp.sum(scores_, axis=-1, keepdims=True)
    r = jnp.arange(seq)
    pos_eff = jnp.abs(r[None, :] - r[:, None]).astype(jnp.float32)[None, None]
    dist = jnp.sqrt(jnp.maximum((disttotal - distcum) * pos_eff, 0.0))
    gamma = -jax.nn.softplus(params["gammas"]).reshape(1, n_heads, 1, 1)
    total_effect = jnp.clip(jnp.exp(dist * gamma), 1e-5, 1e5)
    scores = scores * total_effect
    scores = jnp.where(mask4, scores, -1e32)
    attn = jax.nn.softmax(scores, axis=-1)
    if zero_pad:
        attn = attn.at[:, :, 0, :].set(0.0)
    out = jnp.einsum("bhqk,bhkd->bhqd", attn, vp)
    concat = out.transpose(0, 2, 1, 3).reshape(bs, seq, d_model)
    attn_out = concat @ params["wo_t"] + params["bo"]

    def layer_norm(x, g, b):
        mu = jnp.mean(x, axis=-1, keepdims=True)
        var = jnp.mean((x - mu) ** 2, axis=-1, keepdims=True)
        return (x - mu) / jnp.sqrt(var + ln_eps) * g + b

    x = layer_norm(query + attn_out, params["ln1_g"], params["ln1_b"])
    if apply_pos:
        hdn = jnp.maximum(x @ params["w1_t"] + params["b1"], 0.0)
        x = layer_norm(x + (hdn @ params["w2_t"] + params["b2"]),
                       params["ln2_g"], params["ln2_b"])
    return x


if __name__ == "__main__":
    bs, seq, d_model, n_heads, d_ff = 4, 8, 32, 2, 64
    d_k = d_model // n_heads
    mask_flag = 0          # AKT first block: strictly-past attention, zero_pad=True

    root = jax.random.PRNGKey(0)
    ks = jax.random.split(root, 20)

    def xavier(k_, shape):
        fan_out, fan_in = shape
        bound = math.sqrt(6.0 / (fan_in + fan_out))
        return jax.random.uniform(k_, shape, jnp.float32, -bound, bound)

    def small(k_, shape, s=0.1):
        return s * jax.random.normal(k_, shape, jnp.float32)

    wq = xavier(ks[0], (d_model, d_model))   # kq_same = False: separate q_linear
    wk = xavier(ks[1], (d_model, d_model))
    wv = xavier(ks[2], (d_model, d_model))
    wo = xavier(ks[3], (d_model, d_model))
    w1 = xavier(ks[4], (d_ff, d_model))      # nn.Linear(d_model, d_ff).weight
    w2 = xavier(ks[5], (d_model, d_ff))      # nn.Linear(d_ff, d_model).weight
    gbound = math.sqrt(6.0 / (1 + n_heads))  # xavier_uniform_ on (n_heads, 1, 1)
    gammas = jax.random.uniform(ks[6], (n_heads,), jnp.float32, -gbound, gbound)

    params = dict(
        wq_t=wq.T, bq=small(ks[7], (1, d_model)),
        wk_t=wk.T, bk=small(ks[8], (1, d_model)),
        wv_t=wv.T, bv=small(ks[9], (1, d_model)),
        wo_t=wo.T, bo=small(ks[10], (1, d_model)),
        gammas=gammas,
        ln1_g=1.0 + small(ks[11], (1, d_model)), ln1_b=small(ks[12], (1, d_model)),
        w1_t=w1.T, b1=small(ks[13], (1, d_ff)),
        w2_t=w2.T, b2=small(ks[14], (1, d_model)),
        ln2_g=1.0 + small(ks[15], (1, d_model)), ln2_b=small(ks[16], (1, d_model)),
    )

    query = jax.random.normal(ks[17], (bs, seq, d_model), jnp.float32)
    key_in = jax.random.normal(ks[18], (bs, seq, d_model), jnp.float32)
    values = jax.random.normal(ks[19], (bs, seq, d_model), jnp.float32)

    out = transformer_layer(mask_flag, query, key_in, values, params,
                            n_heads=n_heads, d_k=d_k, d_ff=d_ff, b_tile=2)
    out = jax.block_until_ready(out)

    ref = reference_transformer_layer(mask_flag, query, key_in, values, params,
                                      n_heads=n_heads, d_k=d_k)
    err = float(jnp.max(jnp.abs(out - ref)))
    # Loose-ish tolerance because the kernel's softmax denominators use the EUP
    # approximate reciprocal; outputs are LayerNorm'd (O(1)) so this still
    # clearly separates a correct kernel from a broken one.
    assert err < 5e-2, f"max abs error vs reference: {err}"
    print("KERNEL_OK")
</pallas_src>

<mosaic_0001>
module attributes {stable_mosaic.version = 11 : i64} {
  func.func @_akt_layer_kernel(%arg0: i32, %arg1: memref<16x32xf32, #tpu.memory_space<vmem>>, %arg2: memref<16x32xf32, #tpu.memory_space<vmem>>, %arg3: memref<16x32xf32, #tpu.memory_space<vmem>>, %arg4: memref<1x2xf32, #tpu.memory_space<vmem>>, %arg5: memref<8x8xf32, #tpu.memory_space<vmem>>, %arg6: memref<8x8xf32, #tpu.memory_space<vmem>>, %arg7: memref<8x8xf32, #tpu.memory_space<vmem>>, %arg8: memref<8x8xf32, #tpu.memory_space<vmem>>, %arg9: memref<8x8xf32, #tpu.memory_space<vmem>>, %arg10: memref<32x32xf32, #tpu.memory_space<vmem>>, %arg11: memref<1x32xf32, #tpu.memory_space<vmem>>, %arg12: memref<32x32xf32, #tpu.memory_space<vmem>>, %arg13: memref<1x32xf32, #tpu.memory_space<vmem>>, %arg14: memref<32x32xf32, #tpu.memory_space<vmem>>, %arg15: memref<1x32xf32, #tpu.memory_space<vmem>>, %arg16: memref<32x32xf32, #tpu.memory_space<vmem>>, %arg17: memref<1x32xf32, #tpu.memory_space<vmem>>, %arg18: memref<1x32xf32, #tpu.memory_space<vmem>>, %arg19: memref<1x32xf32, #tpu.memory_space<vmem>>, %arg20: memref<32x64xf32, #tpu.memory_space<vmem>>, %arg21: memref<1x64xf32, #tpu.memory_space<vmem>>, %arg22: memref<64x32xf32, #tpu.memory_space<vmem>>, %arg23: memref<1x32xf32, #tpu.memory_space<vmem>>, %arg24: memref<1x32xf32, #tpu.memory_space<vmem>>, %arg25: memref<1x32xf32, #tpu.memory_space<vmem>>, %arg26: memref<16x32xf32, #tpu.memory_space<vmem>>) attributes {dimension_semantics = [#tpu.dimension_semantics<parallel>], iteration_bounds = array<i64: 2>, scalar_prefetch = 0 : i64, scratch_operands = 0 : i64, tpu.core_type = #tpu.core_type<tc>, window_params = [{transform_indices = @transform_0, window_bounds = array<i64: 16, 32>}, {transform_indices = @transform_1, window_bounds = array<i64: 16, 32>}, {transform_indices = @transform_2, window_bounds = array<i64: 16, 32>}, {pipeline_mode = #tpu.pipeline_mode<synchronous>, transform_indices = @transform_3, window_bounds = array<i64: 1, 2>}, {pipeline_mode = #tpu.pipeline_mode<synchronous>, transform_indices = @transform_4, window_bounds = array<i64: 8, 8>}, {pipeline_mode = #tpu.pipeline_mode<synchronous>, transform_indices = @transform_5, window_bounds = array<i64: 8, 8>}, {pipeline_mode = #tpu.pipeline_mode<synchronous>, transform_indices = @transform_6, window_bounds = array<i64: 8, 8>}, {pipeline_mode = #tpu.pipeline_mode<synchronous>, transform_indices = @transform_7, window_bounds = array<i64: 8, 8>}, {pipeline_mode = #tpu.pipeline_mode<synchronous>, transform_indices = @transform_8, window_bounds = array<i64: 8, 8>}, {pipeline_mode = #tpu.pipeline_mode<synchronous>, transform_indices = @transform_9, window_bounds = array<i64: 32, 32>}, {pipeline_mode = #tpu.pipeline_mode<synchronous>, transform_indices = @transform_10, window_bounds = array<i64: 1, 32>}, {pipeline_mode = #tpu.pipeline_mode<synchronous>, transform_indices = @transform_11, window_bounds = array<i64: 32, 32>}, {pipeline_mode = #tpu.pipeline_mode<synchronous>, transform_indices = @transform_12, window_bounds = array<i64: 1, 32>}, {pipeline_mode = #tpu.pipeline_mode<synchronous>, transform_indices = @transform_13, window_bounds = array<i64: 32, 32>}, {pipeline_mode = #tpu.pipeline_mode<synchronous>, transform_indices = @transform_14, window_bounds = array<i64: 1, 32>}, {pipeline_mode = #tpu.pipeline_mode<synchronous>, transform_indices = @transform_15, window_bounds = array<i64: 32, 32>}, {pipeline_mode = #tpu.pipeline_mode<synchronous>, transform_indices = @transform_16, window_bounds = array<i64: 1, 32>}, {pipeline_mode = #tpu.pipeline_mode<synchronous>, transform_indices = @transform_17, window_bounds = array<i64: 1, 32>}, {pipeline_mode = #tpu.pipeline_mode<synchronous>, transform_indices = @transform_18, window_bounds = array<i64: 1, 32>}, {pipeline_mode = #tpu.pipeline_mode<synchronous>, transform_indices = @transform_19, window_bounds = array<i64: 32, 64>}, {pipeline_mode = #tpu.pipeline_mode<synchronous>, transform_indices = @transform_20, window_bounds = array<i64: 1, 64>}, {pipeline_mode = #tpu.pipeline_mode<synchronous>, transform_indices = @transform_21, window_bounds = array<i64: 64, 32>}, {pipeline_mode = #tpu.pipeline_mode<synchronous>, transform_indices = @transform_22, window_bounds = array<i64: 1, 32>}, {pipeline_mode = #tpu.pipeline_mode<synchronous>, transform_indices = @transform_23, window_bounds = array<i64: 1, 32>}, {pipeline_mode = #tpu.pipeline_mode<synchronous>, transform_indices = @transform_24, window_bounds = array<i64: 1, 32>}, {transform_indices = @transform_25, window_bounds = array<i64: 16, 32>}]} {
    %c0 = arith.constant 0 : index
    %c0_0 = arith.constant 0 : index
    %0 = vector.load %arg1[%c0, %c0_0] : memref<16x32xf32, #tpu.memory_space<vmem>>, vector<16x32xf32>
    %c0_1 = arith.constant 0 : index
    %c0_2 = arith.constant 0 : index
    %1 = vector.load %arg2[%c0_1, %c0_2] : memref<16x32xf32, #tpu.memory_space<vmem>>, vector<16x32xf32>
    %c0_3 = arith.constant 0 : index
    %c0_4 = arith.constant 0 : index
    %2 = vector.load %arg3[%c0_3, %c0_4] : memref<16x32xf32, #tpu.memory_space<vmem>>, vector<16x32xf32>
    %c0_5 = arith.constant 0 : index
    %c0_6 = arith.constant 0 : index
    %3 = vector.load %arg10[%c0_5, %c0_6] : memref<32x32xf32, #tpu.memory_space<vmem>>, vector<32x32xf32>
    %cst = arith.constant dense<0.000000e+00> : vector<16x32xf32>
    %4 = tpu.matmul %0, %3, %cst {dimension_numbers = #tpu.dot_dimension_numbers<[1], [0], [0], [1], [0, 0, 1, 1], [], []>} : vector<16x32xf32>, vector<32x32xf32>, vector<16x32xf32> -> vector<16x32xf32>
    %c0_7 = arith.constant 0 : index
    %c0_8 = arith.constant 0 : index
    %5 = vector.load %arg11[%c0_7, %c0_8] : memref<1x32xf32, #tpu.memory_space<vmem>>, vector<1x32xf32>
    %6 = vector.broadcast %5 : vector<1x32xf32> to vector<16x32xf32>
    %7 = arith.addf %4, %6 : vector<16x32xf32>
    %c0_9 = arith.constant 0 : index
    %c0_10 = arith.constant 0 : index
    %8 = vector.load %arg12[%c0_9, %c0_10] : memref<32x32xf32, #tpu.memory_space<vmem>>, vector<32x32xf32>
    %cst_11 = arith.constant dense<0.000000e+00> : vector<16x32xf32>
    %9 = tpu.matmul %1, %8, %cst_11 {dimension_numbers = #tpu.dot_dimension_numbers<[1], [0], [0], [1], [0, 0, 1, 1], [], []>} : vector<16x32xf32>, vector<32x32xf32>, vector<16x32xf32> -> vector<16x32xf32>
    %c0_12 = arith.constant 0 : index
    %c0_13 = arith.constant 0 : index
    %10 = vector.load %arg13[%c0_12, %c0_13] : memref<1x32xf32, #tpu.memory_space<vmem>>, vector<1x32xf32>
    %11 = vector.broadcast %10 : vector<1x32xf32> to vector<16x32xf32>
    %12 = arith.addf %9, %11 : vector<16x32xf32>
    %c0_14 = arith.constant 0 : index
    %c0_15 = arith.constant 0 : index
    %13 = vector.load %arg14[%c0_14, %c0_15] : memref<32x32xf32, #tpu.memory_space<vmem>>, vector<32x32xf32>
    %cst_16 = arith.constant dense<0.000000e+00> : vector<16x32xf32>
    %14 = tpu.matmul %2, %13, %cst_16 {dimension_numbers = #tpu.dot_dimension_numbers<[1], [0], [0], [1], [0, 0, 1, 1], [], []>} : vector<16x32xf32>, vector<32x32xf32>, vector<16x32xf32> -> vector<16x32xf32>
    %c0_17 = arith.constant 0 : index
    %c0_18 = arith.constant 0 : index
    %15 = vector.load %arg15[%c0_17, %c0_18] : memref<1x32xf32, #tpu.memory_space<vmem>>, vector<1x32xf32>
    %16 = vector.broadcast %15 : vector<1x32xf32> to vector<16x32xf32>
    %17 = arith.addf %14, %16 : vector<16x32xf32>
    %c0_19 = arith.constant 0 : index
    %c0_20 = arith.constant 0 : index
    %18 = vector.load %arg5[%c0_19, %c0_20] : memref<8x8xf32, #tpu.memory_space<vmem>>, vector<8x8xf32>
    %19 = vector.shape_cast %18 : vector<8x8xf32> to vector<1x8x8xf32>
    %c0_21 = arith.constant 0 : index
    %c0_22 = arith.constant 0 : index
    %20 = vector.load %arg6[%c0_21, %c0_22] : memref<8x8xf32, #tpu.memory_space<vmem>>, vector<8x8xf32>
    %21 = vector.shape_cast %20 : vector<8x8xf32> to vector<1x8x8xf32>
    %c0_23 = arith.constant 0 : index
    %c0_24 = arith.constant 0 : index
    %22 = vector.load %arg7[%c0_23, %c0_24] : memref<8x8xf32, #tpu.memory_space<vmem>>, vector<8x8xf32>
    %23 = vector.shape_cast %22 : vector<8x8xf32> to vector<1x8x8xf32>
    %c0_25 = arith.constant 0 : index
    %c0_26 = arith.constant 0 : index
    %24 = vector.load %arg9[%c0_25, %c0_26] : memref<8x8xf32, #tpu.memory_space<vmem>>, vector<8x8xf32>
    %25 = vector.shape_cast %24 : vector<8x8xf32> to vector<1x8x8xf32>
    %c0_27 = arith.constant 0 : index
    %c0_28 = arith.constant 0 : index
    %26 = vector.load %arg8[%c0_27, %c0_28] : memref<8x8xf32, #tpu.memory_space<vmem>>, vector<8x8xf32>
    %27 = vector.shape_cast %26 : vector<8x8xf32> to vector<1x8x8xf32>
    %28 = vector.broadcast %27 : vector<1x8x8xf32> to vector<2x8x8xf32>
    %c0_29 = arith.constant 0 : index
    %c0_30 = arith.constant 0 : index
    %29 = vector.load %arg4[%c0_29, %c0_30] : memref<1x2xf32, #tpu.memory_space<vmem>>, vector<1x2xf32>
    %c0_31 = arith.constant 0 : index
    %c0_32 = arith.constant 0 : index
    %30 = vector.load %arg16[%c0_31, %c0_32] : memref<32x32xf32, #tpu.memory_space<vmem>>, vector<32x32xf32>
    %cst_33 = arith.constant 0.000000e+00 : f32
    %31 = vector.broadcast %cst_33 : f32 to vector<16x32xf32>
    %32 = vector.extract_strided_slice %7 {offsets = [0, 0], sizes = [16, 16], strides = [1, 1]} : vector<16x32xf32> to vector<16x16xf32>
    %33 = vector.shape_cast %32 : vector<16x16xf32> to vector<2x8x16xf32>
    %34 = vector.extract_strided_slice %12 {offsets = [0, 0], sizes = [16, 16], strides = [1, 1]} : vector<16x32xf32> to vector<16x16xf32>
    %35 = vector.shape_cast %34 : vector<16x16xf32> to vector<2x8x16xf32>
    %36 = vector.extract_strided_slice %17 {offsets = [0, 0], sizes = [16, 16], strides = [1, 1]} : vector<16x32xf32> to vector<16x16xf32>
    %37 = vector.shape_cast %36 : vector<16x16xf32> to vector<2x8x16xf32>
    "tpu.trace_start"() <{level = 10 : i32, message = "bqd,bkd->bqk"}> : () -> ()
    %cst_34 = arith.constant dense<0.000000e+00> : vector<2x8x8xf32>
    %38 = tpu.matmul %33, %35, %cst_34 {dimension_numbers = #tpu.dot_dimension_numbers<[2], [2], [1], [1], [0, 0, 0, 1, 1, 1], [0], [0]>} : vector<2x8x16xf32>, vector<2x8x16xf32>, vector<2x8x8xf32> -> vector<2x8x8xf32>
    "tpu.trace_stop"() : () -> ()
    %cst_35 = arith.constant dense<0xFF800000> : vector<2x8xf32>
    %39 = vector.multi_reduction <maximumf>, %38, %cst_35 [2] : vector<2x8x8xf32> to vector<2x8xf32>
    %40 = vector.shape_cast %39 : vector<2x8xf32> to vector<2x8x1xf32>
    %41 = vector.broadcast %40 : vector<2x8x1xf32> to vector<2x8x8xf32>
    %42 = arith.subf %38, %41 : vector<2x8x8xf32>
    %43 = math.exp %42 : vector<2x8x8xf32>
    %cst_36 = arith.constant dense<0.000000e+00> : vector<2x8xf32>
    %44 = vector.multi_reduction <add>, %43, %cst_36 [2] : vector<2x8x8xf32> to vector<2x8xf32>
    %45 = vector.shape_cast %44 : vector<2x8xf32> to vector<2x8x1xf32>
    %46 = tpu.reciprocal %45 {approx = true} : vector<2x8x1xf32> -> vector<2x8x1xf32>
    %47 = vector.broadcast %46 : vector<2x8x1xf32> to vector<2x8x8xf32>
    %48 = arith.mulf %43, %47 : vector<2x8x8xf32>
    %49 = vector.broadcast %19 : vector<1x8x8xf32> to vector<2x8x8xf32>
    %50 = arith.mulf %48, %49 : vector<2x8x8xf32>
    "tpu.trace_start"() <{level = 10 : i32, message = "bqk,bkj->bqj"}> : () -> ()
    %cst_37 = arith.constant dense<0.000000e+00> : vector<2x8x8xf32>
    %51 = tpu.matmul %50, %28, %cst_37 {dimension_numbers = #tpu.dot_dimension_numbers<[2], [1], [1], [2], [0, 0, 0, 1, 1, 2], [0], [0]>} : vector<2x8x8xf32>, vector<2x8x8xf32>, vector<2x8x8xf32> -> vector<2x8x8xf32>
    "tpu.trace_stop"() : () -> ()
    %52 = vector.broadcast %23 : vector<1x8x8xf32> to vector<2x8x8xf32>
    %53 = arith.mulf %51, %52 : vector<2x8x8xf32>
    %cst_38 = arith.constant 0.000000e+00 : f32
    %54 = vector.broadcast %cst_38 : f32 to vector<2x8x8xf32>
    %55 = arith.maximumf %53, %54 : vector<2x8x8xf32>
    %56 = math.sqrt %55 : vector<2x8x8xf32>
    %57 = vector.extract_strided_slice %29 {offsets = [0, 0], sizes = [1, 1], strides = [1, 1]} : vector<1x2xf32> to vector<1x1xf32>
    %58 = vector.shape_cast %57 : vector<1x1xf32> to vector<1x1x1xf32>
    %59 = vector.broadcast %58 : vector<1x1x1xf32> to vector<2x8x8xf32>
    %60 = arith.mulf %56, %59 : vector<2x8x8xf32>
    %61 = math.exp %60 : vector<2x8x8xf32>
    %cst_39 = arith.constant 9.99999974E-6 : f32
    %cst_40 = arith.constant 1.000000e+05 : f32
    %62 = vector.broadcast %cst_39 : f32 to vector<2x8x8xf32>
    %63 = arith.maximumf %62, %61 : vector<2x8x8xf32>
    %64 = vector.broadcast %cst_40 : f32 to vector<2x8x8xf32>
    %65 = arith.minimumf %64, %63 : vector<2x8x8xf32>
    %66 = arith.mulf %38, %65 : vector<2x8x8xf32>
    %67 = vector.broadcast %21 : vector<1x8x8xf32> to vector<2x8x8xf32>
    %68 = arith.addf %66, %67 : vector<2x8x8xf32>
    %cst_41 = arith.constant dense<0xFF800000> : vector<2x8xf32>
    %69 = vector.multi_reduction <maximumf>, %68, %cst_41 [2] : vector<2x8x8xf32> to vector<2x8xf32>
    %70 = vector.shape_cast %69 : vector<2x8xf32> to vector<2x8x1xf32>
    %71 = vector.broadcast %70 : vector<2x8x1xf32> to vector<2x8x8xf32>
    %72 = arith.subf %68, %71 : vector<2x8x8xf32>
    %73 = math.exp %72 : vector<2x8x8xf32>
    %cst_42 = arith.constant dense<0.000000e+00> : vector<2x8xf32>
    %74 = vector.multi_reduction <add>, %73, %cst_42 [2] : vector<2x8x8xf32> to vector<2x8xf32>
    %75 = vector.shape_cast %74 : vector<2x8xf32> to vector<2x8x1xf32>
    %76 = tpu.reciprocal %75 {approx = true} : vector<2x8x1xf32> -> vector<2x8x1xf32>
    %77 = vector.broadcast %76 : vector<2x8x1xf32> to vector<2x8x8xf32>
    %78 = arith.mulf %73, %77 : vector<2x8x8xf32>
    %79 = vector.broadcast %25 : vector<1x8x8xf32> to vector<2x8x8xf32>
    %80 = arith.mulf %78, %79 : vector<2x8x8xf32>
    "tpu.trace_start"() <{level = 10 : i32, message = "bqk,bkd->bqd"}> : () -> ()
    %cst_43 = arith.constant dense<0.000000e+00> : vector<2x8x16xf32>
    %81 = tpu.matmul %80, %37, %cst_43 {dimension_numbers = #tpu.dot_dimension_numbers<[2], [1], [1], [2], [0, 0, 0, 1, 1, 2], [0], [0]>} : vector<2x8x8xf32>, vector<2x8x16xf32>, vector<2x8x16xf32> -> vector<2x8x16xf32>
    "tpu.trace_stop"() : () -> ()
    %82 = vector.shape_cast %81 : vector<2x8x16xf32> to vector<16x16xf32>
    %83 = vector.extract_strided_slice %30 {offsets = [0, 0], sizes = [16, 32], strides = [1, 1]} : vector<32x32xf32> to vector<16x32xf32>
    %cst_44 = arith.constant dense<0.000000e+00> : vector<16x32xf32>
    %84 = tpu.matmul %82, %83, %cst_44 {dimension_numbers = #tpu.dot_dimension_numbers<[1], [0], [0], [1], [0, 0, 1, 1], [], []>} : vector<16x16xf32>, vector<16x32xf32>, vector<16x32xf32> -> vector<16x32xf32>
    %85 = arith.addf %31, %84 : vector<16x32xf32>
    %86 = vector.extract_strided_slice %7 {offsets = [0, 16], sizes = [16, 16], strides = [1, 1]} : vector<16x32xf32> to vector<16x16xf32>
    %87 = vector.shape_cast %86 : vector<16x16xf32> to vector<2x8x16xf32>
    %88 = vector.extract_strided_slice %12 {offsets = [0, 16], sizes = [16, 16], strides = [1, 1]} : vector<16x32xf32> to vector<16x16xf32>
    %89 = vector.shape_cast %88 : vector<16x16xf32> to vector<2x8x16xf32>
    %90 = vector.extract_strided_slice %17 {offsets = [0, 16], sizes = [16, 16], strides = [1, 1]} : vector<16x32xf32> to vector<16x16xf32>
    %91 = vector.shape_cast %90 : vector<16x16xf32> to vector<2x8x16xf32>
    "tpu.trace_start"() <{level = 10 : i32, message = "bqd,bkd->bqk"}> : () -> ()
    %cst_45 = arith.constant dense<0.000000e+00> : vector<2x8x8xf32>
    %92 = tpu.matmul %87, %89, %cst_45 {dimension_numbers = #tpu.dot_dimension_numbers<[2], [2], [1], [1], [0, 0, 0, 1, 1, 1], [0], [0]>} : vector<2x8x16xf32>, vector<2x8x16xf32>, vector<2x8x8xf32> -> vector<2x8x8xf32>
    "tpu.trace_stop"() : () -> ()
    %cst_46 = arith.constant dense<0xFF800000> : vector<2x8xf32>
    %93 = vector.multi_reduction <maximumf>, %92, %cst_46 [2] : vector<2x8x8xf32> to vector<2x8xf32>
    %94 = vector.shape_cast %93 : vector<2x8xf32> to vector<2x8x1xf32>
    %95 = vector.broadcast %94 : vector<2x8x1xf32> to vector<2x8x8xf32>
    %96 = arith.subf %92, %95 : vector<2x8x8xf32>
    %97 = math.exp %96 : vector<2x8x8xf32>
    %cst_47 = arith.constant dense<0.000000e+00> : vector<2x8xf32>
    %98 = vector.multi_reduction <add>, %97, %cst_47 [2] : vector<2x8x8xf32> to vector<2x8xf32>
    %99 = vector.shape_cast %98 : vector<2x8xf32> to vector<2x8x1xf32>
    %100 = tpu.reciprocal %99 {approx = true} : vector<2x8x1xf32> -> vector<2x8x1xf32>
    %101 = vector.broadcast %100 : vector<2x8x1xf32> to vector<2x8x8xf32>
    %102 = arith.mulf %97, %101 : vector<2x8x8xf32>
    %103 = vector.broadcast %19 : vector<1x8x8xf32> to vector<2x8x8xf32>
    %104 = arith.mulf %102, %103 : vector<2x8x8xf32>
    "tpu.trace_start"() <{level = 10 : i32, message = "bqk,bkj->bqj"}> : () -> ()
    %cst_48 = arith.constant dense<0.000000e+00> : vector<2x8x8xf32>
    %105 = tpu.matmul %104, %28, %cst_48 {dimension_numbers = #tpu.dot_dimension_numbers<[2], [1], [1], [2], [0, 0, 0, 1, 1, 2], [0], [0]>} : vector<2x8x8xf32>, vector<2x8x8xf32>, vector<2x8x8xf32> -> vector<2x8x8xf32>
    "tpu.trace_stop"() : () -> ()
    %106 = vector.broadcast %23 : vector<1x8x8xf32> to vector<2x8x8xf32>
    %107 = arith.mulf %105, %106 : vector<2x8x8xf32>
    %cst_49 = arith.constant 0.000000e+00 : f32
    %108 = vector.broadcast %cst_49 : f32 to vector<2x8x8xf32>
    %109 = arith.maximumf %107, %108 : vector<2x8x8xf32>
    %110 = math.sqrt %109 : vector<2x8x8xf32>
    %111 = vector.extract_strided_slice %29 {offsets = [0, 1], sizes = [1, 1], strides = [1, 1]} : vector<1x2xf32> to vector<1x1xf32>
    %112 = vector.shape_cast %111 : vector<1x1xf32> to vector<1x1x1xf32>
    %113 = vector.broadcast %112 : vector<1x1x1xf32> to vector<2x8x8xf32>
    %114 = arith.mulf %110, %113 : vector<2x8x8xf32>
    %115 = math.exp %114 : vector<2x8x8xf32>
    %cst_50 = arith.constant 9.99999974E-6 : f32
    %cst_51 = arith.constant 1.000000e+05 : f32
    %116 = vector.broadcast %cst_50 : f32 to vector<2x8x8xf32>
    %117 = arith.maximumf %116, %115 : vector<2x8x8xf32>
    %118 = vector.broadcast %cst_51 : f32 to vector<2x8x8xf32>
    %119 = arith.minimumf %118, %117 : vector<2x8x8xf32>
    %120 = arith.mulf %92, %119 : vector<2x8x8xf32>
    %121 = vector.broadcast %21 : vector<1x8x8xf32> to vector<2x8x8xf32>
    %122 = arith.addf %120, %121 : vector<2x8x8xf32>
    %cst_52 = arith.constant dense<0xFF800000> : vector<2x8xf32>
    %123 = vector.multi_reduction <maximumf>, %122, %cst_52 [2] : vector<2x8x8xf32> to vector<2x8xf32>
    %124 = vector.shape_cast %123 : vector<2x8xf32> to vector<2x8x1xf32>
    %125 = vector.broadcast %124 : vector<2x8x1xf32> to vector<2x8x8xf32>
    %126 = arith.subf %122, %125 : vector<2x8x8xf32>
    %127 = math.exp %126 : vector<2x8x8xf32>
    %cst_53 = arith.constant dense<0.000000e+00> : vector<2x8xf32>
    %128 = vector.multi_reduction <add>, %127, %cst_53 [2] : vector<2x8x8xf32> to vector<2x8xf32>
    %129 = vector.shape_cast %128 : vector<2x8xf32> to vector<2x8x1xf32>
    %130 = tpu.reciprocal %129 {approx = true} : vector<2x8x1xf32> -> vector<2x8x1xf32>
    %131 = vector.broadcast %130 : vector<2x8x1xf32> to vector<2x8x8xf32>
    %132 = arith.mulf %127, %131 : vector<2x8x8xf32>
    %133 = vector.broadcast %25 : vector<1x8x8xf32> to vector<2x8x8xf32>
    %134 = arith.mulf %132, %133 : vector<2x8x8xf32>
    "tpu.trace_start"() <{level = 10 : i32, message = "bqk,bkd->bqd"}> : () -> ()
    %cst_54 = arith.constant dense<0.000000e+00> : vector<2x8x16xf32>
    %135 = tpu.matmul %134, %91, %cst_54 {dimension_numbers = #tpu.dot_dimension_numbers<[2], [1], [1], [2], [0, 0, 0, 1, 1, 2], [0], [0]>} : vector<2x8x8xf32>, vector<2x8x16xf32>, vector<2x8x16xf32> -> vector<2x8x16xf32>
    "tpu.trace_stop"() : () -> ()
    %136 = vector.shape_cast %135 : vector<2x8x16xf32> to vector<16x16xf32>
    %137 = vector.extract_strided_slice %30 {offsets = [16, 0], sizes = [16, 32], strides = [1, 1]} : vector<32x32xf32> to vector<16x32xf32>
    %cst_55 = arith.constant dense<0.000000e+00> : vector<16x32xf32>
    %138 = tpu.matmul %136, %137, %cst_55 {dimension_numbers = #tpu.dot_dimension_numbers<[1], [0], [0], [1], [0, 0, 1, 1], [], []>} : vector<16x16xf32>, vector<16x32xf32>, vector<16x32xf32> -> vector<16x32xf32>
    %139 = arith.addf %85, %138 : vector<16x32xf32>
    %c0_56 = arith.constant 0 : index
    %c0_57 = arith.constant 0 : index
    %140 = vector.load %arg17[%c0_56, %c0_57] : memref<1x32xf32, #tpu.memory_space<vmem>>, vector<1x32xf32>
    %141 = vector.broadcast %140 : vector<1x32xf32> to vector<16x32xf32>
    %142 = arith.addf %139, %141 : vector<16x32xf32>
    %143 = arith.addf %0, %142 : vector<16x32xf32>
    %c0_58 = arith.constant 0 : index
    %c0_59 = arith.constant 0 : index
    %144 = vector.load %arg18[%c0_58, %c0_59] : memref<1x32xf32, #tpu.memory_space<vmem>>, vector<1x32xf32>
    %c0_60 = arith.constant 0 : index
    %c0_61 = arith.constant 0 : index
    %145 = vector.load %arg19[%c0_60, %c0_61] : memref<1x32xf32, #tpu.memory_space<vmem>>, vector<1x32xf32>
    %cst_62 = arith.constant dense<0.000000e+00> : vector<16xf32>
    %146 = vector.multi_reduction <add>, %143, %cst_62 [1] : vector<16x32xf32> to vector<16xf32>
    %147 = vector.shape_cast %146 : vector<16xf32> to vector<16x1xf32>
    %cst_63 = arith.constant 3.200000e+01 : f32
    %148 = vector.broadcast %cst_63 : f32 to vector<16x1xf32>
    %149 = arith.divf %147, %148 : vector<16x1xf32>
    %150 = vector.broadcast %149 : vector<16x1xf32> to vector<16x32xf32>
    %151 = arith.subf %143, %150 : vector<16x32xf32>
    %152 = arith.mulf %151, %151 : vector<16x32xf32>
    %cst_64 = arith.constant dense<0.000000e+00> : vector<16xf32>
    %153 = vector.multi_reduction <add>, %152, %cst_64 [1] : vector<16x32xf32> to vector<16xf32>
    %154 = vector.shape_cast %153 : vector<16xf32> to vector<16x1xf32>
    %cst_65 = arith.constant 3.200000e+01 : f32
    %155 = vector.broadcast %cst_65 : f32 to vector<16x1xf32>
    %156 = arith.divf %154, %155 : vector<16x1xf32>
    %cst_66 = arith.constant 9.99999974E-6 : f32
    %157 = vector.broadcast %cst_66 : f32 to vector<16x1xf32>
    %158 = arith.addf %156, %157 : vector<16x1xf32>
    %159 = math.rsqrt %158 : vector<16x1xf32>
    %160 = vector.broadcast %159 : vector<16x1xf32> to vector<16x32xf32>
    %161 = arith.mulf %151, %160 : vector<16x32xf32>
    %162 = vector.broadcast %144 : vector<1x32xf32> to vector<16x32xf32>
    %163 = arith.mulf %161, %162 : vector<16x32xf32>
    %164 = vector.broadcast %145 : vector<1x32xf32> to vector<16x32xf32>
    %165 = arith.addf %163, %164 : vector<16x32xf32>
    %c0_67 = arith.constant 0 : index
    %c0_68 = arith.constant 0 : index
    %166 = vector.load %arg20[%c0_67, %c0_68] : memref<32x64xf32, #tpu.memory_space<vmem>>, vector<32x64xf32>
    %cst_69 = arith.constant dense<0.000000e+00> : vector<16x64xf32>
    %167 = tpu.matmul %165, %166, %cst_69 {dimension_numbers = #tpu.dot_dimension_numbers<[1], [0], [0], [1], [0, 0, 1, 1], [], []>} : vector<16x32xf32>, vector<32x64xf32>, vector<16x64xf32> -> vector<16x64xf32>
    %c0_70 = arith.constant 0 : index
    %c0_71 = arith.constant 0 : index
    %168 = vector.load %arg21[%c0_70, %c0_71] : memref<1x64xf32, #tpu.memory_space<vmem>>, vector<1x64xf32>
    %169 = vector.broadcast %168 : vector<1x64xf32> to vector<16x64xf32>
    %170 = arith.addf %167, %169 : vector<16x64xf32>
    %cst_72 = arith.constant 0.000000e+00 : f32
    %171 = vector.broadcast %cst_72 : f32 to vector<16x64xf32>
    %172 = arith.maximumf %170, %171 : vector<16x64xf32>
    %c0_73 = arith.constant 0 : index
    %c0_74 = arith.constant 0 : index
    %173 = vector.load %arg22[%c0_73, %c0_74] : memref<64x32xf32, #tpu.memory_space<vmem>>, vector<64x32xf32>
    %cst_75 = arith.constant dense<0.000000e+00> : vector<16x32xf32>
    %174 = tpu.matmul %172, %173, %cst_75 {dimension_numbers = #tpu.dot_dimension_numbers<[1], [0], [0], [1], [0, 0, 1, 1], [], []>} : vector<16x64xf32>, vector<64x32xf32>, vector<16x32xf32> -> vector<16x32xf32>
    %c0_76 = arith.constant 0 : index
    %c0_77 = arith.constant 0 : index
    %175 = vector.load %arg23[%c0_76, %c0_77] : memref<1x32xf32, #tpu.memory_space<vmem>>, vector<1x32xf32>
    %176 = vector.broadcast %175 : vector<1x32xf32> to vector<16x32xf32>
    %177 = arith.addf %174, %176 : vector<16x32xf32>
    %178 = arith.addf %165, %177 : vector<16x32xf32>
    %c0_78 = arith.constant 0 : index
    %c0_79 = arith.constant 0 : index
    %179 = vector.load %arg24[%c0_78, %c0_79] : memref<1x32xf32, #tpu.memory_space<vmem>>, vector<1x32xf32>
    %c0_80 = arith.constant 0 : index
    %c0_81 = arith.constant 0 : index
    %180 = vector.load %arg25[%c0_80, %c0_81] : memref<1x32xf32, #tpu.memory_space<vmem>>, vector<1x32xf32>
    %cst_82 = arith.constant dense<0.000000e+00> : vector<16xf32>
    %181 = vector.multi_reduction <add>, %178, %cst_82 [1] : vector<16x32xf32> to vector<16xf32>
    %182 = vector.shape_cast %181 : vector<16xf32> to vector<16x1xf32>
    %cst_83 = arith.constant 3.200000e+01 : f32
    %183 = vector.broadcast %cst_83 : f32 to vector<16x1xf32>
    %184 = arith.divf %182, %183 : vector<16x1xf32>
    %185 = vector.broadcast %184 : vector<16x1xf32> to vector<16x32xf32>
    %186 = arith.subf %178, %185 : vector<16x32xf32>
    %187 = arith.mulf %186, %186 : vector<16x32xf32>
    %cst_84 = arith.constant dense<0.000000e+00> : vector<16xf32>
    %188 = vector.multi_reduction <add>, %187, %cst_84 [1] : vector<16x32xf32> to vector<16xf32>
    %189 = vector.shape_cast %188 : vector<16xf32> to vector<16x1xf32>
    %cst_85 = arith.constant 3.200000e+01 : f32
    %190 = vector.broadcast %cst_85 : f32 to vector<16x1xf32>
    %191 = arith.divf %189, %190 : vector<16x1xf32>
    %cst_86 = arith.constant 9.99999974E-6 : f32
    %192 = vector.broadcast %cst_86 : f32 to vector<16x1xf32>
    %193 = arith.addf %191, %192 : vector<16x1xf32>
    %194 = math.rsqrt %193 : vector<16x1xf32>
    %195 = vector.broadcast %194 : vector<16x1xf32> to vector<16x32xf32>
    %196 = arith.mulf %186, %195 : vector<16x32xf32>
    %197 = vector.broadcast %179 : vector<1x32xf32> to vector<16x32xf32>
    %198 = arith.mulf %196, %197 : vector<16x32xf32>
    %199 = vector.broadcast %180 : vector<1x32xf32> to vector<16x32xf32>
    %200 = arith.addf %198, %199 : vector<16x32xf32>
    %c0_87 = arith.constant 0 : index
    %c0_88 = arith.constant 0 : index
    %201 = vector.load %arg26[%c0_87, %c0_88] : memref<16x32xf32, #tpu.memory_space<vmem>>, vector<16x32xf32>
    tpu.vector_store %arg26[%c0_87, %c0_88], %200 {strides = array<i32>} : memref<16x32xf32, #tpu.memory_space<vmem>>, vector<16x32xf32>,
    return
  }
  func.func @transform_0(%arg0: i32) -> (i32, i32) {
    %c0_i32 = arith.constant 0 : i32
    %c0_i32_0 = arith.constant 0 : i32
    return %arg0, %c0_i32 : i32, i32
  }
  func.func @transform_1(%arg0: i32) -> (i32, i32) {
    %c0_i32 = arith.constant 0 : i32
    %c0_i32_0 = arith.constant 0 : i32
    return %arg0, %c0_i32 : i32, i32
  }
  func.func @transform_2(%arg0: i32) -> (i32, i32) {
    %c0_i32 = arith.constant 0 : i32
    %c0_i32_0 = arith.constant 0 : i32
    return %arg0, %c0_i32 : i32, i32
  }
  func.func @transform_3(%arg0: i32) -> (i32, i32) {
    %c0_i32 = arith.constant 0 : i32
    %c0_i32_0 = arith.constant 0 : i32
    %c0_i32_1 = arith.constant 0 : i32
    return %c0_i32, %c0_i32_0 : i32, i32
  }
  func.func @transform_4(%arg0: i32) -> (i32, i32) {
    %c0_i32 = arith.constant 0 : i32
    %c0_i32_0 = arith.constant 0 : i32
    %c0_i32_1 = arith.constant 0 : i32
    return %c0_i32, %c0_i32_0 : i32, i32
  }
  func.func @transform_5(%arg0: i32) -> (i32, i32) {
    %c0_i32 = arith.constant 0 : i32
    %c0_i32_0 = arith.constant 0 : i32
    %c0_i32_1 = arith.constant 0 : i32
    return %c0_i32, %c0_i32_0 : i32, i32
  }
  func.func @transform_6(%arg0: i32) -> (i32, i32) {
    %c0_i32 = arith.constant 0 : i32
    %c0_i32_0 = arith.constant 0 : i32
    %c0_i32_1 = arith.constant 0 : i32
    return %c0_i32, %c0_i32_0 : i32, i32
  }
  func.func @transform_7(%arg0: i32) -> (i32, i32) {
    %c0_i32 = arith.constant 0 : i32
    %c0_i32_0 = arith.constant 0 : i32
    %c0_i32_1 = arith.constant 0 : i32
    return %c0_i32, %c0_i32_0 : i32, i32
  }
  func.func @transform_8(%arg0: i32) -> (i32, i32) {
    %c0_i32 = arith.constant 0 : i32
    %c0_i32_0 = arith.constant 0 : i32
    %c0_i32_1 = arith.constant 0 : i32
    return %c0_i32, %c0_i32_0 : i32, i32
  }
  func.func @transform_9(%arg0: i32) -> (i32, i32) {
    %c0_i32 = arith.constant 0 : i32
    %c0_i32_0 = arith.constant 0 : i32
    %c0_i32_1 = arith.constant 0 : i32
    return %c0_i32, %c0_i32_0 : i32, i32
  }
  func.func @transform_10(%arg0: i32) -> (i32, i32) {
    %c0_i32 = arith.constant 0 : i32
    %c0_i32_0 = arith.constant 0 : i32
    %c0_i32_1 = arith.constant 0 : i32
    return %c0_i32, %c0_i32_0 : i32, i32
  }
  func.func @transform_11(%arg0: i32) -> (i32, i32) {
    %c0_i32 = arith.constant 0 : i32
    %c0_i32_0 = arith.constant 0 : i32
    %c0_i32_1 = arith.constant 0 : i32
    return %c0_i32, %c0_i32_0 : i32, i32
  }
  func.func @transform_12(%arg0: i32) -> (i32, i32) {
    %c0_i32 = arith.constant 0 : i32
    %c0_i32_0 = arith.constant 0 : i32
    %c0_i32_1 = arith.constant 0 : i32
    return %c0_i32, %c0_i32_0 : i32, i32
  }
  func.func @transform_13(%arg0: i32) -> (i32, i32) {
    %c0_i32 = arith.constant 0 : i32
    %c0_i32_0 = arith.constant 0 : i32
    %c0_i32_1 = arith.constant 0 : i32
    return %c0_i32, %c0_i32_0 : i32, i32
  }
  func.func @transform_14(%arg0: i32) -> (i32, i32) {
    %c0_i32 = arith.constant 0 : i32
    %c0_i32_0 = arith.constant 0 : i32
    %c0_i32_1 = arith.constant 0 : i32
    return %c0_i32, %c0_i32_0 : i32, i32
  }
  func.func @transform_15(%arg0: i32) -> (i32, i32) {
    %c0_i32 = arith.constant 0 : i32
    %c0_i32_0 = arith.constant 0 : i32
    %c0_i32_1 = arith.constant 0 : i32
    return %c0_i32, %c0_i32_0 : i32, i32
  }
  func.func @transform_16(%arg0: i32) -> (i32, i32) {
    %c0_i32 = arith.constant 0 : i32
    %c0_i32_0 = arith.constant 0 : i32
    %c0_i32_1 = arith.constant 0 : i32
    return %c0_i32, %c0_i32_0 : i32, i32
  }
  func.func @transform_17(%arg0: i32) -> (i32, i32) {
    %c0_i32 = arith.constant 0 : i32
    %c0_i32_0 = arith.constant 0 : i32
    %c0_i32_1 = arith.constant 0 : i32
    return %c0_i32, %c0_i32_0 : i32, i32
  }
  func.func @transform_18(%arg0: i32) -> (i32, i32) {
    %c0_i32 = arith.constant 0 : i32
    %c0_i32_0 = arith.constant 0 : i32
    %c0_i32_1 = arith.constant 0 : i32
    return %c0_i32, %c0_i32_0 : i32, i32
  }
  func.func @transform_19(%arg0: i32) -> (i32, i32) {
    %c0_i32 = arith.constant 0 : i32
    %c0_i32_0 = arith.constant 0 : i32
    %c0_i32_1 = arith.constant 0 : i32
    return %c0_i32, %c0_i32_0 : i32, i32
  }
  func.func @transform_20(%arg0: i32) -> (i32, i32) {
    %c0_i32 = arith.constant 0 : i32
    %c0_i32_0 = arith.constant 0 : i32
    %c0_i32_1 = arith.constant 0 : i32
    return %c0_i32, %c0_i32_0 : i32, i32
  }
  func.func @transform_21(%arg0: i32) -> (i32, i32) {
    %c0_i32 = arith.constant 0 : i32
    %c0_i32_0 = arith.constant 0 : i32
    %c0_i32_1 = arith.constant 0 : i32
    return %c0_i32, %c0_i32_0 : i32, i32
  }
  func.func @transform_22(%arg0: i32) -> (i32, i32) {
    %c0_i32 = arith.constant 0 : i32
    %c0_i32_0 = arith.constant 0 : i32
    %c0_i32_1 = arith.constant 0 : i32
    return %c0_i32, %c0_i32_0 : i32, i32
  }
  func.func @transform_23(%arg0: i32) -> (i32, i32) {
    %c0_i32 = arith.constant 0 : i32
    %c0_i32_0 = arith.constant 0 : i32
    %c0_i32_1 = arith.constant 0 : i32
    return %c0_i32, %c0_i32_0 : i32, i32
  }
  func.func @transform_24(%arg0: i32) -> (i32, i32) {
    %c0_i32 = arith.constant 0 : i32
    %c0_i32_0 = arith.constant 0 : i32
    %c0_i32_1 = arith.constant 0 : i32
    return %c0_i32, %c0_i32_0 : i32, i32
  }
  func.func @transform_25(%arg0: i32) -> (i32, i32) {
    %c0_i32 = arith.constant 0 : i32
    %c0_i32_0 = arith.constant 0 : i32
    return %arg0, %c0_i32 : i32, i32
  }
}

</mosaic_0001>

<bundles_post_ra>
// kernel: tpu_custom_call.1
= control target key start
LH: loop header
LB: loop body
LE: loop exit
PB: predicated region body
PF: predicated region fallthrough
CT: control target
= control target key end

     0   :  { %s4866_s0 = inlined_call_operand.vmem [shape: f32[32,32], index: 0, kind: input, shape index: {}]   ;;  %s4867_s1 = inlined_call_operand.vmem [shape: f32[32,32], index: 1, kind: input, shape index: {}]   ;;  %s4868_s2 = inlined_call_operand.vmem [shape: f32[32,32], index: 2, kind: input, shape index: {}]   ;;  %s4869_s3 = inlined_call_operand.hbm [shape: f32[1,2], index: 3, kind: input, shape index: {}]   ;;  %s4870_s4 = inlined_call_operand.hbm [shape: f32[8,8], index: 4, kind: input, shape index: {}]   ;;  %s4871_s5 = inlined_call_operand.hbm [shape: f32[8,8], index: 5, kind: input, shape index: {}]   ;;  %s4872_s6 = inlined_call_operand.hbm [shape: f32[8,8], index: 6, kind: input, shape index: {}]   ;;  %s4873_s7 = inlined_call_operand.hbm [shape: f32[8,8], index: 7, kind: input, shape index: {}]   ;;  %s4874_s8 = inlined_call_operand.hbm [shape: f32[8,8], index: 8, kind: input, shape index: {}]   ;;  %s4875_s9 = inlined_call_operand.hbm [shape: f32[32,32], index: 9, kind: input, shape index: {}]   ;;  %s4876_s10 = inlined_call_operand.hbm [shape: f32[1,32], index: 10, kind: input, shape index: {}]   ;;  %s4877_s11 = inlined_call_operand.hbm [shape: f32[32,32], index: 11, kind: input, shape index: {}]   ;;  %s4878_s12 = inlined_call_operand.hbm [shape: f32[1,32], index: 12, kind: input, shape index: {}]   ;;  %s4879_s13 = inlined_call_operand.hbm [shape: f32[32,32], index: 13, kind: input, shape index: {}]   ;;  %s4880_s14 = inlined_call_operand.hbm [shape: f32[1,32], index: 14, kind: input, shape index: {}]   ;;  %s4881_s15 = inlined_call_operand.hbm [shape: f32[32,32], index: 15, kind: input, shape index: {}]   ;;  %s4882_s16 = inlined_call_operand.hbm [shape: f32[1,32], index: 16, kind: input, shape index: {}]   ;;  %s4883_s17 = inlined_call_operand.hbm [shape: f32[1,32], index: 17, kind: input, shape index: {}]   ;;  %s4884_s18 = inlined_call_operand.hbm [shape: f32[1,32], index: 18, kind: input, shape index: {}]   ;;  %s4885_s19 = inlined_call_operand.vmem [shape: f32[32,64], index: 19, kind: input, shape index: {}]   ;;  %s4886_s20 = inlined_call_operand.vmem [shape: f32[1,64], index: 20, kind: input, shape index: {}]   ;;  %s4887_s21 = inlined_call_operand.vmem [shape: f32[64,32], index: 21, kind: input, shape index: {}]   ;;  %s4888_s22 = inlined_call_operand.vmem [shape: f32[1,32], index: 22, kind: input, shape index: {}]   ;;  %s4889_s23 = inlined_call_operand.vmem [shape: f32[1,32], index: 23, kind: input, shape index: {}]   ;;  %s4890_s24 = inlined_call_operand.vmem [shape: f32[1,32], index: 24, kind: input, shape index: {}]   ;;  %s4891_s25 = inlined_call_operand.hbm [shape: f32[32,32], index: 25, kind: output, shape index: {}]  }
   0x1   :  { %4902 = sst [smem:[#allocation45_spill]] %s4866_s0 }
   0x2   :  { %4903 = sst [smem:[#allocation46_spill]] %s4867_s1 }
   0x3   :  { %4904 = sst [smem:[#allocation47_spill]] %s4868_s2 }
   0x4   :  { %4905 = sst [smem:[#allocation48_spill]] %s4869_s3 }
   0x5   :  { %4906 = sst [smem:[#allocation49_spill]] %s4870_s4 }
   0x6   :  { %4907 = sst [smem:[#allocation50_spill]] %s4871_s5 }
   0x7   :  { %4908 = sst [smem:[#allocation51_spill]] %s4872_s6 }
   0x8   :  { %4909 = sst [smem:[#allocation52_spill]] %s4873_s7 }
   0x9   :  { %4910 = sst [smem:[#allocation53_spill]] %s4874_s8 }
   0xa   :  { %4911 = sst [smem:[#allocation54_spill]] %s4875_s9 }
   0xb   :  { %4912 = sst [smem:[#allocation55_spill]] %s4876_s10 }
   0xc   :  { %4913 = sst [smem:[#allocation56_spill]] %s4891_s25 }
   0xd   :  { %30 = vsyncpa [#allocation3], 0 }
   0xe   :  { %31 = vsyncpa [#allocation6], 0 }
   0xf   :  { %32 = vsyncpa [#allocation9], 0 }
  0x10   :  { %33 = vsyncpa [#allocation12], 0 }
  0x11   :  { %34 = vsyncpa [#allocation15], 0 }
  0x12   :  { %35 = vsyncpa [#allocation18], 0 }
  0x13   :  { %36 = vsyncpa [#allocation21], 0 }
  0x14   :  { %37 = vsyncpa [#allocation24], 0 }
  0x15   :  { %38 = vsyncpa [#allocation27], 0 }
  0x16   :  { %39 = vsyncpa [#allocation4], 0 }
  0x17   :  { %41 = vsyncpa [#allocation4 + $0x1], 0  ;;  %s4330_s29 = smov 0   ;;  %s4332_s2 = smov 0  }
  0x18   :  { %s4334_s6 = smov 0   ;;  %s4336_s30 = smov 0  }
  0x19 LB: > { %4914 = sst [smem:[#allocation39_spill]] %s4160_s29  ;;  %s4351_s7 = sadd.s32 4294967295, %s4172_s30   ;;  %s4172_s30 = sphi %s4336_s30, %s4962_s30   ;;  %s4168_s6 = sphi %s4334_s6, %s4964_s6   ;;  %s4164_s2 = sphi %s4332_s2, %s4966_s2   ;;  %s4160_s29 = sphi %s4330_s29, %s4965_s29  }
  0x1a   : > { %4915 = sst [smem:[#allocation40_spill]] %s4168_s6  ;;  %s3099_s3 = sadd.s32 4294967294, %s4172_s30  }
  0x1b   : > { %4916 = sst [smem:[#allocation41_spill]] %s4172_s30  ;;  %s4355_s26 = sadd.s32 1, %s4172_s30  }
  0x1c   : > { %4917 = sst [smem:[#allocation42_spill]] %s4355_s26  ;;  %s594_s1 = sadd.s32 1, %s4168_s6 }
  0x1d   : > { %s591_s8 = ssub.s32 %s4172_s30, %s4355_s26  ;;  %p604_p0 = scmp.ne.s32.totalorder %s4168_s6, %s4164_s2 }
  0x1e   : > { %p592_p1 = scmp.eq.s32.totalorder %s591_s8, 0  ;;  %p605_p2 = scmp.eq.s32.totalorder %s4351_s7, 1 }
  0x1f   : > { %p610_p3 = scmp.ne.s32.totalorder %s4164_s2, %s4160_s29  ;;  %p611_p4 = scmp.eq.s32.totalorder %s3099_s3, 1 }
  0x20   : > { %s4366_s27 = scalar_select %p592_p1, %s4168_s6, %s594_s1  }
  0x21   : > { %p4368_p5 = por %p605_p2, %p604_p0  ;;  %p4372_p6 = por %p611_p4, %p610_p3 }
  0x22   : > { %4918 = sst [smem:[#allocation43_spill]] %s4366_s27  ;;  %p3100_p7 = scmp.ge.s32.totalorder %s4172_s30, 1 }
  0x23   : > { %s4919_s4 = scalar_select %p4368_p5, 1, 0 }
  0x24   : > { %s4920_s28 = scalar_select %p4372_p6, 1, 0 }
  0x25   : > { %p618_p8 = scmp.lt.s32.totalorder %s4172_s30, 3  ;;  %p4897_p9 = scmp.eq.s32.totalorder %s4351_s7, 0 }
  0x26   : > { %4921 = sst [smem:[#allocation44_spill]] %s4920_s28  ;;  %s4174_s5 = smov [#allocation5]  }
  0x27   : > { %p4379_p10 = pnand %p3100_p7, %p618_p8  ;;  %s642_s0 = sshll.u32 %s4174_s5, 4  ;;  %s643_s0 = int_to_ptr.vmem [resolvable:$true] %s642_s0 }
  0x28   : > { %s4175_s3 = smov [#allocation8]   ;;  %s4176_s27 = smov [#allocation11]  }
  0x29   : > { %s4922_s9 = scalar_select %p4379_p10, 1, 0 }
  0x2a   : > { %p3458_p11 = pneg %p4379_p10  ;;  %s664_s1 = sshll.u32 %s4175_s3, 4  ;;  %s665_s1 = int_to_ptr.vmem [resolvable:$true] %s664_s1 }
  0x2b   : > { %s686_s6 = sshll.u32 %s4176_s27, 4  ;;  %s3671_s5 = scalar_lea.vmem %s643_s0, 128  ;;  %s4391_s6 = int_to_ptr.vmem [resolvable:$true] %s686_s6 }
  0x2c   : > { %p4387_p12 = pnand %p4897_p9, %p3458_p11  ;;  %p3672_p0 = scmp.ne.s32.totalorder %s643_s0, %s3671_s5 }
  0x2d   : > { %p3679_p3 = scmp.lt.s32.totalorder %s643_s0, %s643_s0  ;;  %p3680_p4 = scmp.lt.s32.totalorder %s3671_s5, %s3671_s5 }
  0x2e   : > { %p4395_p13 = pneg %p4387_p12 }
  0x2f   : > { %p3681_p7 = por %p3680_p4, %p3679_p3 }
  0x30   : > { %p3674_p1 = pnand %p3672_p0, %p4395_p13 }
  0x32   : > { %p3675_p2 = pneg %p3674_p1 }
  0x34   : > { %p3682_p8 = pnand %p3681_p7, %p3675_p2 }
  0x36   : > { %3685 = shalt.err (!%p3682_p8)
}
  0x37   : > { %s4925_s28 = sld [smem:[#allocation49_spill]]  ;;  %s3697_s29 = scalar_lea.vmem %s665_s1, 128 }
  0x38   : > { %p3698_p11 = scmp.ne.s32.totalorder %s665_s1, %s3697_s29  ;;  %p3705_p5 = scmp.lt.s32.totalorder %s665_s1, %s665_s1 }
  0x39   : > { %p3706_p0 = scmp.lt.s32.totalorder %s3697_s29, %s3697_s29 }
  0x3a   : > { %p3700_p9 = pnand %p3698_p11, %p4395_p13 }
  0x3b   : > { %p3707_p1 = por %p3706_p0, %p3705_p5 }
  0x3c   : > { %p3701_p6 = pneg %p3700_p9 }
  0x3d   : > { %3464 = dma.hbm_to_vmem [thread:$0]  (!%p4387_p12), %s4925_s28, 128, %s643_s0, [#allocation6]  }
  0x3e   : > { %p3708_p10 = pnand %p3707_p1, %p3701_p6 }
  0x40   : > { %3711 = shalt.err (!%p3708_p10)
}
  0x41   : > { %s4926_s25 = sld [smem:[#allocation51_spill]]  ;;  %s3723_s28 = scalar_lea.vmem %s4391_s6, 128 }
  0x42   : > { %p3724_p2 = scmp.ne.s32.totalorder %s4391_s6, %s3723_s28  ;;  %p3731_p4 = scmp.lt.s32.totalorder %s4391_s6, %s4391_s6 }
  0x43   : > { %p3732_p5 = scmp.lt.s32.totalorder %s3723_s28, %s3723_s28 }
  0x44   : > { %p3726_p3 = pnand %p3724_p2, %p4395_p13 }
  0x45   : > { %p3733_p6 = por %p3732_p5, %p3731_p4 }
  0x46   : > { %p3727_p9 = pneg %p3726_p3 }
  0x47   : > { %3470 = dma.hbm_to_vmem [thread:$0]  (!%p4387_p12), %s4926_s25, 128, %s665_s1, [#allocation9]  }
  0x48   : > { %p3734_p10 = pnand %p3733_p6, %p3727_p9 }
  0x4a   : > { %3737 = shalt.err (!%p3734_p10)
}
  0x4b   : > { %s4927_s0 = sld [smem:[#allocation53_spill]]  ;;  %s4177_s25 = smov [#allocation14]  }
  0x4c   : > { %s710_s1 = sshll.u32 %s4177_s25, 4  ;;  %s4178_s27 = smov [#allocation17]   ;;  %s711_s1 = int_to_ptr.vmem [resolvable:$true] %s710_s1 }
  0x4d   : > { %s734_s3 = sshll.u32 %s4178_s27, 4  ;;  %s3749_s5 = scalar_lea.vmem %s711_s1, 16  ;;  %s735_s3 = int_to_ptr.vmem [resolvable:$true] %s734_s3 }
  0x4e   : > { %p3750_p7 = scmp.ne.s32.totalorder %s711_s1, %s3749_s5  ;;  %s3756_s28 = scalar_lea.vmem %s711_s1, 32 }
  0x4f   : > { %p3757_p0 = scmp.lt.s32.totalorder %s711_s1, %s711_s1  ;;  %p3758_p1 = scmp.lt.s32.totalorder %s3756_s28, %s3749_s5 }
  0x50   : > { %p3752_p8 = pnand %p3750_p7, %p4395_p13 }
  0x51   : > { %3476 = dma.hbm_to_vmem [thread:$0]  (!%p4387_p12), %s4927_s0, 128, %s4391_s6, [#allocation12]  }
  0x52   : > { %p3753_p11 = pneg %p3752_p8  ;;  %p3759_p2 = por %p3758_p1, %p3757_p0 }
  0x54   : > { %p3760_p3 = pnand %p3759_p2, %p3753_p11 }
  0x56   : > { %3763 = shalt.err (!%p3760_p3)
}
  0x57   : > { %s4928_s10 = sld [smem:[#allocation55_spill]]  ;;  %s3775_s30 = scalar_lea.vmem %s735_s3, 16 }
  0x58   : > { %p3776_p9 = scmp.ne.s32.totalorder %s735_s3, %s3775_s30  ;;  %s3782_s0 = scalar_lea.vmem %s735_s3, 32 }
  0x59   : > { %p3783_p6 = scmp.lt.s32.totalorder %s735_s3, %s735_s3  ;;  %p3784_p10 = scmp.lt.s32.totalorder %s3782_s0, %s3775_s30 }
  0x5a   : > { %p3778_p4 = pnand %p3776_p9, %p4395_p13 }
  0x5b   : > { %p3785_p7 = por %p3784_p10, %p3783_p6 }
  0x5c   : > { %p3779_p5 = pneg %p3778_p4 }
  0x5d   : > { %3482 = dma.hbm_to_vmem [thread:$0]  (!%p4387_p12), %s4928_s10, 16, %s711_s1, [#allocation15]  }
  0x5e   : > { %p3786_p8 = pnand %p3785_p7, %p3779_p5 }
  0x60   : > { %3789 = shalt.err (!%p3786_p8)
}
  0x61   : > { %3488 = dma.hbm_to_vmem [thread:$0]  (!%p4387_p12), %s4878_s12, 16, %s735_s3, [#allocation18]  }
  0x62   : > { %s4179_s1 = smov [#allocation20]   ;;  %s4180_s28 = smov [#allocation23]  }
  0x63   : > { %s758_s5 = sshll.u32 %s4179_s1, 4  ;;  %s782_s29 = sshll.u32 %s4180_s28, 4  ;;  %s759_s5 = int_to_ptr.vmem [resolvable:$true] %s758_s5  ;;  %s783_s29 = int_to_ptr.vmem [resolvable:$true] %s782_s29 }
  0x64   : > { %s3801_s6 = scalar_lea.vmem %s759_s5, 16  ;;  %s3808_s30 = scalar_lea.vmem %s759_s5, 32 }
  0x65   : > { %p3802_p11 = scmp.ne.s32.totalorder %s759_s5, %s3801_s6  ;;  %p3809_p2 = scmp.lt.s32.totalorder %s759_s5, %s759_s5 }
  0x66   : > { %p3810_p3 = scmp.lt.s32.totalorder %s3808_s30, %s3801_s6 }
  0x67   : > { %p3804_p0 = pnand %p3802_p11, %p4395_p13 }
  0x68   : > { %p3811_p9 = por %p3810_p3, %p3809_p2 }
  0x69   : > { %p3805_p1 = pneg %p3804_p0 }
  0x6b   : > { %p3812_p4 = pnand %p3811_p9, %p3805_p1 }
  0x6d   : > { %3815 = shalt.err (!%p3812_p4)
}
  0x6e   : > { %3494 = dma.hbm_to_vmem [thread:$0]  (!%p4387_p12), %s4880_s14, 16, %s759_s5, [#allocation21]  }
  0x6f   : > { %s3827_s25 = scalar_lea.vmem %s783_s29, 16  ;;  %s3834_s27 = scalar_lea.vmem %s783_s29, 32 }
  0x70   : > { %p3828_p5 = scmp.ne.s32.totalorder %s783_s29, %s3827_s25  ;;  %p3835_p7 = scmp.lt.s32.totalorder %s783_s29, %s783_s29 }
  0x71   : > { %p3836_p8 = scmp.lt.s32.totalorder %s3834_s27, %s3827_s25 }
  0x72   : > { %p3830_p6 = pnand %p3828_p5, %p4395_p13 }
  0x73   : > { %p3837_p11 = por %p3836_p8, %p3835_p7 }
  0x74   : > { %p3831_p10 = pneg %p3830_p6 }
  0x76   : > { %p3838_p0 = pnand %p3837_p11, %p3831_p10 }
  0x78   : > { %3841 = shalt.err (!%p3838_p0)
}
  0x79   : > { %3500 = dma.hbm_to_vmem [thread:$0]  (!%p4387_p12), %s4882_s16, 16, %s783_s29, [#allocation24]  }
  0x7a   : > { %s4181_s5 = smov [#allocation2]   ;;  %s4182_s30 = smov [#allocation7]  }
  0x7b   : > { %s631_s6 = sshll.u32 %s4181_s5, 4  ;;  %s653_s0 = sshll.u32 %s4182_s30, 4  ;;  %s632_s6 = int_to_ptr.vmem [resolvable:$true] %s631_s6  ;;  %s654_s0 = int_to_ptr.vmem [resolvable:$true] %s653_s0 }
  0x7c   : > { %s3853_s3 = scalar_lea.vmem %s632_s6, 16  ;;  %s3860_s25 = scalar_lea.vmem %s632_s6, 32 }
  0x7d   : > { %p3854_p1 = scmp.ne.s32.totalorder %s632_s6, %s3853_s3  ;;  %p3861_p9 = scmp.lt.s32.totalorder %s632_s6, %s632_s6 }
  0x7e   : > { %p3862_p4 = scmp.lt.s32.totalorder %s3860_s25, %s3853_s3 }
  0x7f   : > { %p3856_p2 = pnand %p3854_p1, %p4395_p13 }
  0x80   : > { %p3863_p5 = por %p3862_p4, %p3861_p9 }
  0x81   : > { %p3857_p3 = pneg %p3856_p2 }
  0x83   : > { %p3864_p6 = pnand %p3863_p5, %p3857_p3 }
  0x85   : > { %3867 = shalt.err (!%p3864_p6)
}
  0x86   : > { %s4929_s1 = sld [smem:[#allocation48_spill]]  ;;  %s3879_s28 = scalar_lea.vmem %s654_s0, 128 }
  0x87   : > { %p3880_p10 = scmp.ne.s32.totalorder %s654_s0, %s3879_s28  ;;  %p3887_p11 = scmp.lt.s32.totalorder %s654_s0, %s654_s0 }
  0x88   : > { %p3888_p0 = scmp.lt.s32.totalorder %s3879_s28, %s3879_s28 }
  0x89   : > { %p3882_p7 = pnand %p3880_p10, %p4395_p13 }
  0x8a   : > { %p3889_p1 = por %p3888_p0, %p3887_p11 }
  0x8b   : > { %p3883_p8 = pneg %p3882_p7 }
  0x8c   : > { %3461 = dma.hbm_to_vmem [thread:$0]  (!%p4387_p12), %s4929_s1, 16, %s632_s6, [#allocation3]  }
  0x8d   : > { %p3890_p2 = pnand %p3889_p1, %p3883_p8 }
  0x8f   : > { %3893 = shalt.err (!%p3890_p2)
}
  0x90   : > { %s4930_s3 = sld [smem:[#allocation50_spill]]  ;;  %s4183_s25 = smov [#allocation10]  }
  0x91   : > { %s675_s6 = sshll.u32 %s4183_s25, 4  ;;  %s4184_s27 = smov [#allocation13]   ;;  %s676_s6 = int_to_ptr.vmem [resolvable:$true] %s675_s6 }
  0x92   : > { %s696_s29 = sshll.u32 %s4184_s27, 4  ;;  %s3905_s1 = scalar_lea.vmem %s676_s6, 128  ;;  %s697_s29 = int_to_ptr.vmem [resolvable:$true] %s696_s29 }
  0x93   : > { %p3906_p3 = scmp.ne.s32.totalorder %s676_s6, %s3905_s1  ;;  %p3913_p5 = scmp.lt.s32.totalorder %s676_s6, %s676_s6 }
  0x94   : > { %p3914_p6 = scmp.lt.s32.totalorder %s3905_s1, %s3905_s1 }
  0x95   : > { %p3908_p9 = pnand %p3906_p3, %p4395_p13 }
  0x96   : > { %3467 = dma.hbm_to_vmem [thread:$0]  (!%p4387_p12), %s4930_s3, 128, %s654_s0, [#allocation6]  }
  0x97   : > { %p3909_p4 = pneg %p3908_p9  ;;  %p3915_p10 = por %p3914_p6, %p3913_p5 }
  0x99   : > { %p3916_p7 = pnand %p3915_p10, %p3909_p4 }
  0x9b   : > { %3919 = shalt.err (!%p3916_p7)
}
  0x9c   : > { %s4931_s0 = sld [smem:[#allocation52_spill]]  ;;  %s3931_s30 = scalar_lea.vmem %s697_s29, 512 }
  0x9d   : > { %p3932_p8 = scmp.ne.s32.totalorder %s697_s29, %s3931_s30  ;;  %p3939_p1 = scmp.lt.s32.totalorder %s697_s29, %s697_s29 }
  0x9e   : > { %p3940_p2 = scmp.lt.s32.totalorder %s3931_s30, %s3931_s30 }
  0x9f   : > { %p3934_p11 = pnand %p3932_p8, %p4395_p13 }
  0xa0   : > { %p3941_p3 = por %p3940_p2, %p3939_p1 }
  0xa1   : > { %p3935_p0 = pneg %p3934_p11 }
  0xa2   : > { %3473 = dma.hbm_to_vmem [thread:$0]  (!%p4387_p12), %s4931_s0, 128, %s676_s6, [#allocation9]  }
  0xa3   : > { %p3942_p9 = pnand %p3941_p3, %p3935_p0 }
  0xa5   : > { %3945 = shalt.err (!%p3942_p9)
}
  0xa6   : > { %s4185_s3 = smov 128   ;;  %s4186_s25 = smov 8  }
  0xa7   : > { %s4932_s1 = sld [smem:[#allocation54_spill]]  ;;  %s4187_s28 = smov [#allocation16]  }
  0xa8   : > { %s720_s5 = sshll.u32 %s4187_s28, 4  ;;  %s4188_s0 = smov [#allocation19]   ;;  %s721_s5 = int_to_ptr.vmem [resolvable:$true] %s720_s5 }
  0xa9   : > { %s744_s30 = sshll.u32 %s4188_s0, 4  ;;  %s3957_s10 = scalar_lea.vmem %s721_s5, 512  ;;  %s745_s30 = int_to_ptr.vmem [resolvable:$true] %s744_s30 }
  0xaa   : > { %p3958_p4 = scmp.ne.s32.totalorder %s721_s5, %s3957_s10  ;;  %p3965_p10 = scmp.lt.s32.totalorder %s721_s5, %s721_s5 }
  0xab   : > { %p3966_p7 = scmp.lt.s32.totalorder %s3957_s10, %s3957_s10 }
  0xac   : > { %p3960_p5 = pnand %p3958_p4, %p4395_p13 }
  0xad   : > { %3479 = dma.hbm_to_vmem [thread:$0]  (!%p4387_p12), %s4932_s1, 512, %s697_s29, [#allocation12], %s4185_s3, %s4185_s3, %s4186_s25  }
  0xae   : > { %p3961_p6 = pneg %p3960_p5  ;;  %p3967_p8 = por %p3966_p7, %p3965_p10 }
  0xb0   : > { %p3968_p11 = pnand %p3967_p8, %p3961_p6 }
  0xb2   : > { %3971 = shalt.err (!%p3968_p11)
}
  0xb3   : > { %3485 = dma.hbm_to_vmem [thread:$0]  (!%p4387_p12), %s4877_s11, 512, %s721_s5, [#allocation15], %s4185_s3, %s4185_s3, %s4186_s25  }
  0xb4   : > { %s3983_s27 = scalar_lea.vmem %s745_s30, 512  ;;  %p3991_p3 = scmp.lt.s32.totalorder %s745_s30, %s745_s30 }
  0xb5   : > { %p3984_p0 = scmp.ne.s32.totalorder %s745_s30, %s3983_s27  ;;  %p3992_p9 = scmp.lt.s32.totalorder %s3983_s27, %s3983_s27 }
  0xb7   : > { %p3986_p1 = pnand %p3984_p0, %p4395_p13  ;;  %p3993_p4 = por %p3992_p9, %p3991_p3 }
  0xb9   : > { %p3987_p2 = pneg %p3986_p1 }
  0xbb   : > { %p3994_p5 = pnand %p3993_p4, %p3987_p2 }
  0xbd   : > { %3997 = shalt.err (!%p3994_p5)
}
  0xbe   : > { %3491 = dma.hbm_to_vmem [thread:$0]  (!%p4387_p12), %s4879_s13, 512, %s745_s30, [#allocation18], %s4185_s3, %s4185_s3, %s4186_s25  }
  0xbf   : > { %s4189_s28 = smov [#allocation22]   ;;  %s4190_s0 = smov [#allocation25]  }
  0xc0   : > { %s768_s5 = sshll.u32 %s4189_s28, 4  ;;  %s793_s29 = sshll.u32 %s4190_s0, 4  ;;  %s769_s5 = int_to_ptr.vmem [resolvable:$true] %s768_s5  ;;  %s794_s29 = int_to_ptr.vmem [resolvable:$true] %s793_s29 }
  0xc1   : > { %s4009_s6 = scalar_lea.vmem %s769_s5, 512  ;;  %p4017_p8 = scmp.lt.s32.totalorder %s769_s5, %s769_s5 }
  0xc2   : > { %p4010_p6 = scmp.ne.s32.totalorder %s769_s5, %s4009_s6  ;;  %p4018_p11 = scmp.lt.s32.totalorder %s4009_s6, %s4009_s6 }
  0xc4   : > { %p4012_p10 = pnand %p4010_p6, %p4395_p13  ;;  %p4019_p0 = por %p4018_p11, %p4017_p8 }
  0xc6   : > { %p4013_p7 = pneg %p4012_p10 }
  0xc8   : > { %p4020_p1 = pnand %p4019_p0, %p4013_p7 }
  0xca   : > { %4023 = shalt.err (!%p4020_p1)
}
  0xcb   : > { %3497 = dma.hbm_to_vmem [thread:$0]  (!%p4387_p12), %s4881_s15, 512, %s769_s5, [#allocation21], %s4185_s3, %s4185_s3, %s4186_s25  }
  0xcc   : > { %s4035_s10 = scalar_lea.vmem %s794_s29, 16  ;;  %s4042_s1 = scalar_lea.vmem %s794_s29, 32 }
  0xcd   : > { %p4036_p2 = scmp.ne.s32.totalorder %s794_s29, %s4035_s10  ;;  %p4043_p4 = scmp.lt.s32.totalorder %s794_s29, %s794_s29 }
  0xce   : > { %p4044_p5 = scmp.lt.s32.totalorder %s4042_s1, %s4035_s10 }
  0xcf   : > { %p4038_p3 = pnand %p4036_p2, %p4395_p13 }
  0xd0   : > { %p4045_p6 = por %p4044_p5, %p4043_p4 }
  0xd1   : > { %p4039_p9 = pneg %p4038_p3 }
  0xd3   : > { %p4046_p10 = pnand %p4045_p6, %p4039_p9 }
  0xd5   : > { %4049 = shalt.err (!%p4046_p10)
}
  0xd6   : > { %3503 = dma.hbm_to_vmem [thread:$0]  (!%p4387_p12), %s4883_s17, 16, %s794_s29, [#allocation24]  }
  0xd7   : > { %s4191_s3 = smov [#allocation26]  }
  0xd8   : > { %s804_s25 = sshll.u32 %s4191_s3, 4  ;;  %s805_s25 = int_to_ptr.vmem [resolvable:$true] %s804_s25 }
  0xd9   : > { %s4061_s5 = scalar_lea.vmem %s805_s25, 16  ;;  %s4068_s6 = scalar_lea.vmem %s805_s25, 32 }
  0xda   : > { %p4062_p7 = scmp.ne.s32.totalorder %s805_s25, %s4061_s5  ;;  %p4069_p0 = scmp.lt.s32.totalorder %s805_s25, %s805_s25 }
  0xdb   : > { %p4070_p1 = scmp.lt.s32.totalorder %s4068_s6, %s4061_s5 }
  0xdc   : > { %p4064_p8 = pnand %p4062_p7, %p4395_p13 }
  0xdd   : > { %p4071_p2 = por %p4070_p1, %p4069_p0 }
  0xde   : > { %p4065_p11 = pneg %p4064_p8 }
  0xe0   : > { %p4072_p3 = pnand %p4071_p2, %p4065_p11 }
  0xe2   : > { %4075 = shalt.err (!%p4072_p3)
}
  0xe3   : > { %3506 = dma.hbm_to_vmem [thread:$0]  (!%p4387_p12), %s4884_s18, 16, %s805_s25, [#allocation27]  }
  0xe4   : > { %p4933_p9 = scmp.ne.s32.totalorder %s4922_s9, 0 }
  0xe5   : > { %p4934_p4 = scmp.eq.s32.totalorder (!%p4933_p9), %s4351_s7, 0 }
  0xe6   : > { %862 = sbr.rel (%p4933_p9) target bundleno = 4046 (0xfce), region = 120 }
  0xeb   : > { %4119 = dma.done.wait (%p4934_p4), [#allocation3], 16   ;;  %p4935_p13 = pmov %p4934_p4 }
  0xec   : > { %p4936_p5 = pmov %p4934_p4 }
  0xed   : > { %4121 = vsyncadd (%p4935_p13), [#allocation3], 4294967280 }
  0xee   : > { %4123 = dma.done.wait (%p4936_p5), [#allocation6], 256   ;;  %p4937_p6 = pmov %p4934_p4 }
  0xef   : > { %p4938_p10 = pmov %p4934_p4 }
  0xf0   : > { %4125 = vsyncadd (%p4937_p6), [#allocation6], 4294967040 }
  0xf1   : > { %4127 = dma.done.wait (%p4938_p10), [#allocation9], 256   ;;  %p4939_p12 = pmov %p4934_p4 }
  0xf2   : > { %p4940_p7 = pmov %p4934_p4 }
  0xf3   : > { %4129 = vsyncadd (%p4939_p12), [#allocation9], 4294967040 }
  0xf4   : > { %4131 = dma.done.wait (%p4940_p7), [#allocation12], 640   ;;  %p4941_p8 = pmov %p4934_p4 }
  0xf5   : > { %p4942_p11 = pmov %p4934_p4 }
  0xf6   : > { %4133 = vsyncadd (%p4941_p8), [#allocation12], 4294966656 }
  0xf7   : > { %4135 = dma.done.wait (%p4942_p11), [#allocation15], 528   ;;  %p4943_p0 = pmov %p4934_p4 }
  0xf9   : > { %4137 = vsyncadd (%p4943_p0), [#allocation15], 4294966768  ;;  %p4944_p1 = pmov %p4943_p0 }
  0xfa   : > { %p4945_p2 = pmov %p4943_p0 }
  0xfb   : > { %4139 = dma.done.wait (%p4944_p1), [#allocation18], 528  }
  0xfc   : > { %4141 = vsyncadd (%p4945_p2), [#allocation18], 4294966768  ;;  %p4946_p3 = pmov %p4943_p0 }
  0xfd   : > { %p4947_p9 = pmov %p4943_p0 }
  0xfe   : > { %4143 = dma.done.wait (%p4946_p3), [#allocation21], 528  }
  0xff   : > { %4145 = vsyncadd (%p4947_p9), [#allocation21], 4294966768  ;;  %p4948_p4 = pmov %p4943_p0 }
 0x100   : > { %p4949_p13 = pmov %p4943_p0 }
 0x101   : > { %4147 = dma.done.wait (%p4948_p4), [#allocation24], 32  }
 0x102   : > { %4149 = vsyncadd (%p4949_p13), [#allocation24], 4294967264  ;;  %p4950_p5 = pmov %p4943_p0 }
 0x103   : > { %p4951_p6 = pmov %p4943_p0 }
 0x104   : > { %4151 = dma.done.wait (%p4950_p5), [#allocation27], 16  }
 0x105   : > { %4153 = vsyncadd (%p4951_p6), [#allocation27], 4294967280  ;;  %s3136_s26 = sshll.u32 %s4351_s7, 1  ;;  %v1121_v0 = vld [vmem:[#allocation16 + $0x18] sm:$0xff]  ;;  %v1120_v2 = vld [vmem:[#allocation16 + $0x10] sm:$0xff]  ;;  %s4952_s10 = sld [smem:[#allocation46_spill]] }
 0x106   : > { %p1001_p10 = scmp.lt.s32.totalorder %s3136_s26, 3  ;;  %v1028_v1 = vld [vmem:[#allocation13 + $0x18] sm:$0xff]  ;;  %3266 = vmatprep.subr.mxu1 %v1121_v0  ;;  %v1027_v3 = vld [vmem:[#allocation13 + $0x10] sm:$0xff]  ;;  %v1026_v5 = vld [vmem:[#allocation13 + $0x8] sm:$0xff]  ;;  %vm1036_vm0 = vcmask 261120   ;;  %s4953_s3 = sld [smem:[#allocation45_spill]] }
 0x107   : > { %3255 = vmatprep.subr.mxu0 %v1028_v1  ;;  %3267 = vmatpush3.msra.mxu1 %v1121_v0  ;;  %v1119_v4 = vld [vmem:[#allocation16 + $0x8] sm:$0xff]  ;;  %v1118_v6 = vld [vmem:[#allocation16] sm:$0xff]  ;;  %v1212_v13 = vld [vmem:[#allocation19 + $0x10] sm:$0xff]  ;;  %s4954_s30 = sld [smem:[#allocation47_spill]]  ;;  %v4192_v18 = vmov 0.0   ;;  %vm4193_vm1 = vmmov 0  }
 0x108   : > { %s4968_s26 = smov (!%p1001_p10, %s3136_s26), 3  ;;  %3256 = vmatpush3.msra.mxu0 %v1028_v1  ;;  %3268 = vmatprep.subr.mxu1 %v1120_v2  ;;  %v1025_v8 = vld [vmem:[#allocation13] sm:$0xff]  ;;  %v1211_v14 = vld [vmem:[#allocation19 + $0x8] sm:$0xff]  ;;  %vm1312_vm2 = vcmask 130048   ;;  %vm1465_vm3 = vcmask 64512   ;;  %v4194_v49 = vmov 0  }
 0x109   : > { %s4567_s9 = sshll.u32 %s4968_s26, 3  ;;  %3257 = vmatprep.subr.mxu0 %v1027_v3  ;;  %3269 = vmatpush3.msra.mxu1 %v1120_v2  ;;  %v1213_v11 = vld [vmem:[#allocation19 + $0x18] sm:$0xff]  ;;  %v1210_v15 = vld [vmem:[#allocation19] sm:$0xff]  ;;  %v4633_v47 = vld [vmem:[#allocation10] sm:$0xff]  ;;  %s4195_s26 = smov 112   ;;  %vm2714_vm12 = vcmask 523264  }
 0x10a   : > { %3258 = vmatpush3.msra.mxu0 %v1027_v3  ;;  %3270 = vmatprep.subr.mxu1 %v1119_v4  ;;  %v3145_v19 = vld [vmem:[#allocation17] ss:$0 sm:$0xff]  ;;  %v3142_v21 = vld [vmem:[#allocation14] ss:$0 sm:$0xff]  ;;  %v4639_v48 = vld [vmem:[#allocation2] ss:$0 sm:$0xff] }
 0x10b   : > { %s1010_s1 = scalar_lea.vmem %s4952_s10, %s4567_s9  ;;  %3259 = vmatprep.subr.mxu0 %v1026_v5  ;;  %3271 = vmatpush3.msra.mxu1 %v1119_v4  ;;  %v4642_v53 = vld [vmem:[#allocation5] sm:$0xff]  ;;  %v3148_v54 = vld [vmem:[#allocation20] ss:$0 sm:$0xff]  ;;  %v4660_v62 = vld [vmem:[#allocation8] sm:$0xff]  ;;  %s3188_s0 = sshll.u32 %s4351_s7, 8 }
 0x10c   : > { %v1021_v7 = vld [vmem:[%s1010_s1] sm:$0xff]  ;;  %s1004_s25 = scalar_lea.vmem %s4953_s3, %s4567_s9  ;;  %3260 = vmatpush3.msra.mxu0 %v1026_v5  ;;  %v1022_v9 = vld [vmem:[%s1010_s1 + $0x8] sm:$0xff]  ;;  %3272 = vmatprep.subr.mxu1 %v1118_v6  ;;  %p4957_p7 = scmp.ne.s32.totalorder %s4919_s4, 0 }
 0x10d   : > { %3274 = vmatprep.mubr.msk.f32.mxu1 %vm1036_vm0, %v1021_v7  ;;  %v4578_v10 = vld [vmem:[%s1004_s25] sm:$0xff]  ;;  %3273 = vmatpush3.msra.mxu1 %v1118_v6  ;;  %v4580_v12 = vld [vmem:[%s1004_s25 + $0x8] sm:$0xff]  ;;  %s1016_s27 = scalar_lea.vmem %s4954_s30, %s4567_s9  ;;  %s997_s9 = sand.u32 1, %s4164_s2  }
 0x10e   : > { %3261 = vmatprep.subr.mxu0 %v1025_v8  ;;  %3275 = vmatmul.mubr.msk.f32.vlgmr.msra.gmra.mxu1 %vm1036_vm0, %v1022_v9  ;;  %v1023_v16 = vld [vmem:[%s1016_s27] sm:$0xff]  ;;  %v1024_v17 = vld [vmem:[%s1016_s27 + $0x8] sm:$0xff]  ;;  %s3135_s10 = sshll.u32 %s997_s9, 4  ;;  %s4955_s30 = sld [smem:[#allocation56_spill]] }
 0x10f   : > { %3262 = vmatpush3.msra.mxu0 %v1025_v8  ;;  %3263 = vmatprep.mubr.msk.f32.mxu0 %vm1036_vm0, %v4578_v10  ;;  %s999_s3 = scalar_lea.vmem [#allocation28], %s3135_s10  ;;  %s4826_s8 = scalar_lea.sflag [#allocation4], %s997_s9 }
 0x110   : > { %3277 = vmatprep.subr.mxu0 %v1213_v11  ;;  %3264 = vmatmul.mubr.msk.f32.vlgmr.msra.gmra.mxu0 %vm1036_vm0, %v4580_v12  ;;  %s2858_s25 = sshll.u32 %s999_s3, 4  ;;  %s4197_s29 = smov [#allocation28]   ;;  %s4823_s25 = int_to_ptr.vmem [resolvable:$true] %s2858_s25 }
 0x111   : > { %3278 = vmatpush3.msra.mxu0 %v1213_v11  ;;  %3285 = vmatprep.mubr.msk.f32.mxu0 %vm1036_vm0, %v1023_v16  ;;  %s4076_s7 = scalar_lea.vmem %s4823_s25, 256  ;;  %s4080_s10 = sshll.u32 %s4197_s29, 4  ;;  %s4081_s10 = int_to_ptr.vmem [resolvable:$false] %s4080_s10 }
 0x112   : > { %3279 = vmatprep.subr.mxu0 %v1212_v13  ;;  %3293 = vmatprep.subr.mxu1 %v4192_v18  ;;  %p4077_p12 = scmp.ne.s32.totalorder %s4823_s25, %s4076_s7  ;;  %s4082_s1 = scalar_lea.vmem %s4081_s10, 512 }
 0x113   : > { %3280 = vmatpush3.msra.mxu0 %v1212_v13  ;;  %3295 = vmatprep.mubr.msk.f32.mxu1 %vm4193_vm1, %v4192_v18  ;;  %p4083_p0 = scmp.lt.s32.totalorder %s4823_s25, %s4081_s10  ;;  %p4084_p1 = scmp.lt.s32.totalorder %s4082_s1, %s4076_s7 }
 0x114   : > { %3281 = vmatprep.subr.mxu0 %v1211_v14  ;;  %3601 = vset.pattern.permute.xlu0 %v4194_v49  ;;  %s4956_s27 = smov %s4955_s30  ;;  %p4078_p8 = pnand %p4077_p12, %p4957_p7 }
 0x115   : > { %3282 = vmatpush3.msra.mxu0 %v1211_v14  ;;  %p4085_p2 = por %p4084_p1, %p4083_p0 }
 0x116   : > { %3283 = vmatprep.subr.mxu0 %v1210_v15  ;;  %p4079_p11 = pneg %p4078_p8 }
 0x117   : > { %3284 = vmatpush3.msra.mxu0 %v1210_v15 }
 0x118   : > { %3286 = vmatmul.mubr.msk.f32.vlgmr.msra.gmra.mxu0 %vm1036_vm0, %v1024_v17  ;;  %3288 = vmatprep.subr.mxu0 %v4192_v18  ;;  %p4086_p3 = pnand %p4085_p2, %p4079_p11 }
 0x119   : > { %3290 = vmatprep.mubr.msk.f32.mxu0 %vm4193_vm1, %v4192_v18 }
 0x1ce   : > { %v3276_v20 = vpop.f32.mrf.mxu1 }
 0x1cf   : > { %v4599_v22 = vadd.f32 %v3276_v20, %v3145_v19 }
 0x1d0   : > { %v3265_v23 = vpop.f32.mrf.mxu0  ;;  %v1201_v24 = vpop.f32.mrf.mxu1 }
 0x1d1   : > { %v4601_v25 = vadd.f32 %v3265_v23, %v3142_v21  ;;  %v4603_v26 = vadd.f32 %v3145_v19, %v1201_v24  ;;  %3294 = vmatpush3.xpose.msk.msra.mxu1 %vm1312_vm2, %v4599_v22 }
 0x1d2   : > { %v1109_v27 = vpop.f32.mrf.mxu0  ;;  %3303 = vmatprep.subr.mxu1 %v4192_v18 }
 0x1d3   : > { %3289 = vmatpush3.xpose.msk.msra.mxu0 %vm1312_vm2, %v4603_v26  ;;  %v4610_v28 = vadd.f32 %v3142_v21, %v1109_v27 }
 0x1d4   : > { %3296 = vmatmul.mubr.msk.f32.vlgmr.msra.gmra.mxu1 %vm1312_vm2, %v4601_v25  ;;  %3298 = vmatprep.subr.mxu0 %v4192_v18 }
 0x1d5   : > { %3305 = vmatprep.mubr.msk.f32.mxu1 %vm4193_vm1, %v4192_v18  ;;  %3304 = vmatpush3.msra.mxu1 %v4633_v47 }
 0x1d6   : > { %3291 = vmatmul.mubr.msk.f32.vlgmr.msra.gmra.mxu0 %vm1312_vm2, %v4610_v28  ;;  %3313 = vmatprep.subr.mxu1 %v4192_v18 }
 0x1d7   : > { %3300 = vmatprep.mubr.msk.f32.mxu0 %vm4193_vm1, %v4192_v18  ;;  %3299 = vmatpush3.msra.mxu0 %v4633_v47 }
 0x1d8   : > { %v3287_v29 = vpop.f32.mrf.mxu0  ;;  %3308 = vmatprep.subr.mxu0 %v4192_v18 }
 0x1d9   : > { %v4653_v61 = vadd.f32 %v3287_v29, %v3148_v54 }
 0x1da   : > { %v1293_v30 = vpop.f32.mrf.mxu0 }
 0x1db   : > { %v4645_v58 = vadd.f32 %v3148_v54, %v1293_v30 }
 0x294   : > { %v4621_v31 = vpop.f32.mrf.mxu1 }
 0x295   : > { %v1469_v36 = vsel %vm1465_vm3, %v4621_v31, -inf }
 0x296   : > { %v4623_v32 = vpop.f32.mrf.mxu0  ;;  %v3297_v33 = vpop.f32.mrf.mxu1 }
 0x297   : > { %v1466_v34 = vsel %vm1465_vm3, %v4623_v32, -inf }
 0x298   : > { %1467 = vmax.xlane.f32.xlu0 %v1466_v34  ;;  %v3292_v35 = vpop.f32.mrf.mxu0 }
 0x299   : > { %v4664_v35 = vld [vmem:[#allocation7] sm:$0xff] }
 0x29c   : > { %1470 = vmax.xlane.f32.xlu0 %v1469_v36 }
 0x2b2   : > { %1660 = vperm.xlu0 %3601, %v4639_v48  }
 0x321   : > { %v1468_v37 = vpop.xlane.xlu0 %1467 }
 0x322   : > { %v1472_v38 = vsub.f32 %v4623_v32, %v1468_v37 }
 0x324   : > { %v1474_v39 = vmul.f32 1.442695, %v1472_v38 }
 0x325   : > { %v1471_v40 = vpop.xlane.xlu0 %1470 }
 0x326   : > { %3604 = vpow2.f32 %v1474_v39  ;;  %v1473_v41 = vsub.f32 %v4621_v31, %v1471_v40 }
 0x328   : > { %v1476_v42 = vmul.f32 1.442695, %v1473_v41 }
 0x32a   : > { %3606 = vpow2.f32 %v1476_v42 }
 0x32d   : > { %v1661_v9 = vpop.permute.xlu0 %1660 }
 0x333   : > { %v3605_v43 = vpop.eup %3604 }
 0x334   : > { %v1478_v44 = vsel %vm1465_vm3, %v3605_v43, 0.0 }
 0x335   : > { %1479 = vadd.xlane.f32.xlu1 %v1478_v44 }
 0x337   : > { %v3607_v45 = vpop.eup %3606 }
 0x338   : > { %v1481_v46 = vsel %vm1465_vm3, %v3607_v45, 0.0 }
 0x339   : > { %1482 = vadd.xlane.f32.xlu1 %v1481_v46 }
 0x3be   : > { %v1480_v50 = vpop.xlane.xlu1 %1479 }
 0x3bf   : > { %3608 = vrcp.f32 %v1480_v50 }
 0x3c2   : > { %v1483_v51 = vpop.xlane.xlu1 %1482 }
 0x3c3   : > { %3610 = vrcp.f32 %v1483_v51 }
 0x3cc   : > { %v3609_v52 = vpop.eup %3608 }
 0x3cd   : > { %v1486_v55 = vmul.f32 %v3609_v52, %v3605_v43 }
 0x3cf   : > { %v1488_v56 = vmul.f32 %v1486_v55, %v4642_v53 }
 0x3d0   : > { %v3611_v57 = vpop.eup %3610 }
 0x3d1   : > { %3301 = vmatmul.mubr.msk.f32.vlgmr.msra.gmra.mxu0 %vm1465_vm3, %v1488_v56  ;;  %v1487_v59 = vmul.f32 %v3611_v57, %v3607_v45 }
 0x3d2   : > { %3309 = vmatpush3.msra.mxu0 %v4645_v58  ;;  %3310 = vmatprep.mubr.msk.f32.mxu0 %vm4193_vm1, %v4192_v18 }
 0x3d3   : > { %v1489_v60 = vmul.f32 %v1487_v59, %v4642_v53  ;;  %3318 = vmatprep.subr.mxu0 %v4192_v18  ;;  %v4682_v59 = vld [vmem:[#allocation11] sm:$0xff] }
 0x3d5   : > { %3306 = vmatmul.mubr.msk.f32.vlgmr.msra.gmra.mxu1 %vm1465_vm3, %v1489_v60 }
 0x3d6   : > { %3314 = vmatpush3.msra.mxu1 %v4653_v61  ;;  %3315 = vmatprep.mubr.msk.f32.mxu1 %vm4193_vm1, %v4192_v18 }
 0x3d7   : > { %3323 = vmatprep.subr.mxu1 %v4192_v18 }
 0x491   : > { %v1559_v63 = vpop.f32.mrf.mxu0 }
 0x492   : > { %v1636_v0 = vmul.f32 %v1559_v63, %v4660_v62 }
 0x493   : > { %v3302_v1 = vpop.f32.mrf.mxu0 }
 0x494   : > { %v1638_v2 = vmax.f32 %v1636_v0, 0.0 }
 0x495   : > { %v1632_v3 = vpop.f32.mrf.mxu1 }
 0x496   : > { %3612 = vrsqrt.f32 %v1638_v2  ;;  %v1637_v4 = vmul.f32 %v1632_v3, %v4660_v62  ;;  %vm1642_vm4 = vcmp.eq.f32.partialorder %v1638_v2, inf  ;;  %v1645_v11 = vand.u32 2147483648, %v1638_v2 }
 0x497   : > { %v3307_v5 = vpop.f32.mrf.mxu1  ;;  %vm1644_vm5 = vcmp.eq.f32.partialorder %v1638_v2, 0.0  ;;  %v4196_v3 = vmov 1  }
 0x498   : > { %v1639_v6 = vmax.f32 %v1637_v4, 0.0  ;;  %3602 = vset.pattern.permute.xlu1 %v4196_v3  ;;  %3603 = vset.pattern.permute.xlu0 %v4196_v3 }
 0x49a   : > { %3614 = vrsqrt.f32 %v1639_v6  ;;  %vm1649_vm6 = vcmp.eq.f32.partialorder %v1639_v6, inf  ;;  %v1652_v19 = vand.u32 2147483648, %v1639_v6  ;;  %vm1651_vm7 = vcmp.eq.f32.partialorder %v1639_v6, 0.0 }
 0x4a3   : > { %v3613_v7 = vpop.eup %3612 }
 0x4a4   : > { %v1641_v8 = vmul.f32 %v3613_v7, %v1638_v2 }
 0x4a6   : > { %v1643_v13 = vsel %vm1642_vm4, %v1638_v2, %v1641_v8 }
 0x4a7   : > { %v3615_v14 = vpop.eup %3614  ;;  %v1646_v15 = vsel %vm1644_vm5, %v1645_v11, %v1643_v13 }
 0x4a8   : > { %v1648_v16 = vmul.f32 %v3615_v14, %v1639_v6  ;;  %v1663_v17 = vmul.f32 %v1661_v9, %v1646_v15 }
 0x4aa   : > { %v1650_v20 = vsel %vm1649_vm6, %v1639_v6, %v1648_v16  ;;  %v1665_v21 = vmul.f32 1.442695, %v1663_v17 }
 0x4ab   : > { %v1653_v23 = vsel %vm1651_vm7, %v1652_v19, %v1650_v20 }
 0x4ac   : > { %v1664_v24 = vmul.f32 %v1661_v9, %v1653_v23  ;;  %3616 = vpow2.f32 %v1665_v21 }
 0x4ae   : > { %v1667_v27 = vmul.f32 1.442695, %v1664_v24 }
 0x4b0   : > { %3618 = vpow2.f32 %v1667_v27 }
 0x4b9   : > { %v3617_v29 = vpop.eup %3616 }
 0x4ba   : > { %v1669_v30 = vmax.f32 %v3617_v29, 1e-05 }
 0x4bc   : > { %v1671_v33 = vmin.f32 %v1669_v30, 100000.0 }
 0x4bd   : > { %v3619_v34 = vpop.eup %3618 }
 0x4be   : > { %v1670_v36 = vmax.f32 %v3619_v34, 1e-05  ;;  %v1673_v37 = vmul.f32 %v1671_v33, %v4623_v32 }
 0x4c0   : > { %v1675_v38 = vadd.f32 %v1673_v37, %v4664_v35  ;;  %v1672_v39 = vmin.f32 %v1670_v36, 100000.0 }
 0x4c2   : > { %v1677_v40 = vsel %vm1465_vm3, %v1675_v38, -inf  ;;  %v1674_v41 = vmul.f32 %v1672_v39, %v4621_v31 }
 0x4c3   : > { %1678 = vmax.xlane.f32.xlu1 %v1677_v40 }
 0x4c4   : > { %v1676_v42 = vadd.f32 %v1674_v41, %v4664_v35 }
 0x4c6   : > { %v1680_v43 = vsel %vm1465_vm3, %v1676_v42, -inf }
 0x4c7   : > { %1681 = vmax.xlane.f32.xlu1 %v1680_v43 }
 0x4d8   : > { %1849 = vrot.lane.b32.xlu1 %v4603_v26, %s4195_s26 }
 0x4dc   : > { %1927 = vrot.lane.b32.xlu1 %v4599_v22, %s4195_s26 }
 0x4e0   : > { %1847 = vrot.lane.b32.xlu1 %v4610_v28, %s4195_s26 }
 0x54c   : > { %v1679_v32 = vpop.xlane.xlu1 %1678 }
 0x54d   : > { %v1683_v44 = vsub.f32 %v1675_v38, %v1679_v32 }
 0x54f   : > { %v1685_v46 = vmul.f32 1.442695, %v1683_v44 }
 0x550   : > { %v1682_v45 = vpop.xlane.xlu1 %1681 }
 0x551   : > { %v1684_v31 = vsub.f32 %v1676_v42, %v1682_v45 }
 0x553   : > { %v1687_v49 = vmul.f32 1.442695, %v1684_v31 }
 0x554   : > { %v1850_v22 = vpop.permute.xlu1 %1849 }
 0x555   : > { %3620 = vpow2.f32 %v1687_v49 }
 0x556   : > { %3622 = vpow2.f32 %v1685_v46 }
 0x558   : > { %v1928_v28 = vpop.permute.xlu1 %1927 }
 0x55c   : > { %v1848_v54 = vpop.permute.xlu1 %1847 }
 0x562   : > { %v3621_v50 = vpop.eup %3620 }
 0x563   : > { %v1692_v51 = vsel %vm1465_vm3, %v3621_v50, 0.0  ;;  %v3623_v52 = vpop.eup %3622 }
 0x564   : > { %1693 = vadd.xlane.f32.xlu1 %v1692_v51  ;;  %v1689_v26 = vsel %vm1465_vm3, %v3623_v52, 0.0 }
 0x568   : > { %1690 = vadd.xlane.f32.xlu1 %v1689_v26 }
 0x579   : > { %1925 = vrot.lane.b32.xlu1 %v4601_v25, %s4195_s26 }
 0x5ed   : > { %v1694_v55 = vpop.xlane.xlu1 %1693 }
 0x5ee   : > { %3624 = vrcp.f32 %v1694_v55 }
 0x5f1   : > { %v1691_v56 = vpop.xlane.xlu1 %1690 }
 0x5f2   : > { %3626 = vrcp.f32 %v1691_v56 }
 0x5f5   : > { %v1926_v2 = vpop.permute.xlu1 %1925 }
 0x5fb   : > { %v3625_v57 = vpop.eup %3624 }
 0x5fc   : > { %v1698_v60 = vmul.f32 %v3625_v57, %v3621_v50 }
 0x5fe   : > { %v1700_v63 = vmul.f32 %v1698_v60, %v4682_v59 }
 0x5ff   : > { %v3627_v0 = vpop.eup %3626 }
 0x600   : > { %3316 = vmatmul.mubr.msk.f32.vlgmr.msra.gmra.mxu1 %vm1465_vm3, %v1700_v63  ;;  %v1697_v1 = vmul.f32 %v3627_v0, %v3623_v52 }
 0x601   : > { %3324 = vmatpush3.xpose.msk.msra.mxu1 %vm1312_vm2, %v1928_v28  ;;  %3325 = vmatprep.mubr.msk.f32.mxu1 %vm4193_vm1, %v4192_v18 }
 0x602   : > { %v1699_v25 = vmul.f32 %v1697_v1, %v4682_v59  ;;  %3333 = vmatprep.subr.mxu1 %v4192_v18 }
 0x604   : > { %3311 = vmatmul.mubr.msk.f32.vlgmr.msra.gmra.mxu0 %vm1465_vm3, %v1699_v25  ;;  %3326 = vmatmul.mubr.msk.f32.vlgmr.msra.gmra.mxu1 %vm1312_vm2, %v1926_v2 }
 0x605   : > { %3319 = vmatpush3.xpose.msk.msra.mxu0 %vm1312_vm2, %v1850_v22  ;;  %3320 = vmatprep.mubr.msk.f32.mxu0 %vm4193_vm1, %v4192_v18 }
 0x606   : > { %3328 = vmatprep.subr.mxu0 %v4192_v18  ;;  %3334 = vmatpush3.msra.mxu1 %v4633_v47 }
 0x607   : > { %3335 = vmatprep.mubr.msk.f32.mxu1 %vm4193_vm1, %v4192_v18  ;;  %3343 = vmatprep.subr.mxu1 %v4192_v18 }
 0x608   : > { %3321 = vmatmul.mubr.msk.f32.vlgmr.msra.gmra.mxu0 %vm1312_vm2, %v1848_v54 }
 0x609   : > { %3329 = vmatpush3.msra.mxu0 %v4633_v47  ;;  %3330 = vmatprep.mubr.msk.f32.mxu0 %vm4193_vm1, %v4192_v18 }
 0x60a   : > { %3338 = vmatprep.subr.mxu0 %v4192_v18 }
 0x6c0   : > { %v4706_v4 = vpop.f32.mrf.mxu1 }
 0x6c2   : > { %v3317_v5 = vpop.f32.mrf.mxu1 }
 0x6c4   : > { %v4708_v6 = vpop.f32.mrf.mxu0  ;;  %v4710_v7 = vpop.f32.mrf.mxu1 }
 0x6c5   : > { %v2006_v8 = vsel %vm1465_vm3, %v4710_v7, -inf }
 0x6c6   : > { %2007 = vmax.xlane.f32.xlu1 %v2006_v8  ;;  %v3312_v47 = vpop.f32.mrf.mxu0  ;;  %v3327_v9 = vpop.f32.mrf.mxu1 }
 0x6c8   : > { %v4714_v11 = vpop.f32.mrf.mxu0 }
 0x6c9   : > { %v2003_v13 = vsel %vm1465_vm3, %v4714_v11, -inf }
 0x6ca   : > { %2004 = vmax.xlane.f32.xlu0 %v2003_v13  ;;  %v3322_v14 = vpop.f32.mrf.mxu0 }
 0x6d7   : > { %2192 = vperm.xlu1 %3602, %v4639_v48  }
 0x6db   : > { %2234 = vrot.lane.b32.xlu1 %v4645_v58, %s4195_s26 }
 0x74f   : > { %v2008_v15 = vpop.xlane.xlu1 %2007 }
 0x750   : > { %v2010_v16 = vsub.f32 %v4710_v7, %v2008_v15 }
 0x752   : > { %v2013_v20 = vmul.f32 1.442695, %v2010_v16 }
 0x753   : > { %v2005_v17 = vpop.xlane.xlu0 %2004  ;;  %v2193_v30 = vpop.permute.xlu1 %2192 }
 0x754   : > { %v2009_v19 = vsub.f32 %v4714_v11, %v2005_v17 }
 0x756   : > { %v2011_v21 = vmul.f32 1.442695, %v2009_v19 }
 0x757   : > { %v2235_v38 = vpop.permute.xlu1 %2234 }
 0x758   : > { %3628 = vpow2.f32 %v2011_v21 }
 0x759   : > { %3630 = vpow2.f32 %v2013_v20 }
 0x765   : > { %v3629_v23 = vpop.eup %3628 }
 0x766   : > { %v2015_v24 = vsel %vm1465_vm3, %v3629_v23, 0.0  ;;  %v3631_v27 = vpop.eup %3630 }
 0x767   : > { %2016 = vadd.xlane.f32.xlu0 %v2015_v24  ;;  %v2018_v48 = vsel %vm1465_vm3, %v3631_v27, 0.0 }
 0x76b   : > { %2019 = vadd.xlane.f32.xlu0 %v2018_v48 }
 0x7f0   : > { %v2017_v29 = vpop.xlane.xlu0 %2016 }
 0x7f1   : > { %3632 = vrcp.f32 %v2017_v29 }
 0x7f4   : > { %v2020_v58 = vpop.xlane.xlu0 %2019 }
 0x7f5   : > { %3634 = vrcp.f32 %v2020_v58 }
 0x7fe   : > { %v3633_v33 = vpop.eup %3632 }
 0x7ff   : > { %v2023_v34 = vmul.f32 %v3633_v33, %v3629_v23 }
 0x801   : > { %v2025_v36 = vmul.f32 %v2023_v34, %v4642_v53  ;;  %v1308_v34 = vld [vmem:[#allocation22] sm:$0xff] }
 0x802   : > { %v3635_v37 = vpop.eup %3634 }
 0x803   : > { %3331 = vmatmul.mubr.msk.f32.vlgmr.msra.gmra.mxu0 %vm1465_vm3, %v2025_v36  ;;  %v2024_v39 = vmul.f32 %v3635_v37, %v3631_v27  ;;  %v1309_v27 = vld [vmem:[#allocation22 + $0x8] sm:$0xff]  ;;  %v1311_v37 = vld [vmem:[#allocation22 + $0x18] sm:$0xff] }
 0x804   : > { %3339 = vmatpush3.msra.mxu0 %v2235_v38  ;;  %3340 = vmatprep.mubr.msk.f32.mxu0 %vm4193_vm1, %v4192_v18  ;;  %v1310_v38 = vld [vmem:[#allocation22 + $0x10] sm:$0xff] }
 0x805   : > { %v2026_v40 = vmul.f32 %v2024_v39, %v4642_v53  ;;  %3348 = vmatprep.subr.mxu0 %v1311_v37 }
 0x807   : > { %3336 = vmatmul.mubr.msk.f32.vlgmr.msra.gmra.mxu1 %vm1465_vm3, %v2026_v40 }
 0x808   : > { %3345 = vmatprep.mubr.msk.f32.mxu1 %vm4193_vm1, %v4192_v18 }
 0x8c3   : > { %v2096_v41 = vpop.f32.mrf.mxu0 }
 0x8c4   : > { %v2173_v42 = vmul.f32 %v2096_v41, %v4660_v62 }
 0x8c5   : > { %v3332_v43 = vpop.f32.mrf.mxu0 }
 0x8c6   : > { %v2175_v32 = vmax.f32 %v2173_v42, 0.0  ;;  %v3172_v43 = vld [vmem:[#allocation23] ss:$0 sm:$0xff] }
 0x8c7   : > { %v2169_v44 = vpop.f32.mrf.mxu1 }
 0x8c8   : > { %3636 = vrsqrt.f32 %v2175_v32  ;;  %v2174_v45 = vmul.f32 %v2169_v44, %v4660_v62  ;;  %vm2179_vm8 = vcmp.eq.f32.partialorder %v2175_v32, inf  ;;  %v2182_v53 = vand.u32 2147483648, %v2175_v32 }
 0x8c9   : > { %v3337_v31 = vpop.f32.mrf.mxu1  ;;  %vm2181_vm9 = vcmp.eq.f32.partialorder %v2175_v32, 0.0 }
 0x8ca   : > { %v2176_v46 = vmax.f32 %v2174_v45, 0.0 }
 0x8cc   : > { %3638 = vrsqrt.f32 %v2176_v46  ;;  %vm2186_vm10 = vcmp.eq.f32.partialorder %v2176_v46, inf  ;;  %v2189_v28 = vand.u32 2147483648, %v2176_v46  ;;  %vm2188_vm11 = vcmp.eq.f32.partialorder %v2176_v46, 0.0 }
 0x8d5   : > { %v3637_v49 = vpop.eup %3636 }
 0x8d6   : > { %v2178_v50 = vmul.f32 %v3637_v49, %v2175_v32 }
 0x8d8   : > { %v2180_v51 = vsel %vm2179_vm8, %v2175_v32, %v2178_v50 }
 0x8d9   : > { %v3639_v52 = vpop.eup %3638  ;;  %v2183_v18 = vsel %vm2181_vm9, %v2182_v53, %v2180_v51 }
 0x8da   : > { %v2185_v26 = vmul.f32 %v3639_v52, %v2176_v46  ;;  %v2195_v22 = vmul.f32 %v2193_v30, %v2183_v18 }
 0x8dc   : > { %v2197_v54 = vmul.f32 1.442695, %v2195_v22  ;;  %v2187_v55 = vsel %vm2186_vm10, %v2176_v46, %v2185_v26 }
 0x8dd   : > { %v2190_v56 = vsel %vm2188_vm11, %v2189_v28, %v2187_v55 }
 0x8de   : > { %3640 = vpow2.f32 %v2197_v54  ;;  %v2196_v62 = vmul.f32 %v2193_v30, %v2190_v56 }
 0x8e0   : > { %v2199_v57 = vmul.f32 1.442695, %v2196_v62 }
 0x8e2   : > { %3642 = vpow2.f32 %v2199_v57  ;;  %v2607_v57 = vld [vmem:[%s4885_s19 + $0x10] sm:$0xff] }
 0x8eb   : > { %v3641_v60 = vpop.eup %3640 }
 0x8ec   : > { %v2201_v63 = vmax.f32 %v3641_v60, 1e-05  ;;  %v2606_v60 = vld [vmem:[%s4885_s19 + $0x8] sm:$0xff] }
 0x8ee   : > { %v2203_v0 = vmin.f32 %v2201_v63, 100000.0  ;;  %v2605_v63 = vld [vmem:[%s4885_s19] sm:$0xff] }
 0x8ef   : > { %v3643_v1 = vpop.eup %3642 }
 0x8f0   : > { %v2205_v25 = vmul.f32 %v2203_v0, %v4714_v11  ;;  %v2202_v2 = vmax.f32 %v3643_v1, 1e-05  ;;  %v2706_v0 = vld [vmem:[%s4887_s21 + $0x38] sm:$0xff]  ;;  %v2705_v1 = vld [vmem:[%s4887_s21 + $0x30] sm:$0xff] }
 0x8f2   : > { %v2207_v3 = vadd.f32 %v2205_v25, %v4664_v35  ;;  %v2204_v5 = vmin.f32 %v2202_v2, 100000.0  ;;  %v2704_v25 = vld [vmem:[%s4887_s21 + $0x28] sm:$0xff]  ;;  %v2703_v2 = vld [vmem:[%s4887_s21 + $0x20] sm:$0xff] }
 0x8f4   : > { %v2209_v8 = vsel %vm1465_vm3, %v2207_v3, -inf  ;;  %v2206_v47 = vmul.f32 %v2204_v5, %v4710_v7 }
 0x8f5   : > { %2210 = vmax.xlane.f32.xlu0 %v2209_v8 }
 0x8f6   : > { %v2208_v9 = vadd.f32 %v2206_v47, %v4664_v35 }
 0x8f8   : > { %v2212_v13 = vsel %vm1465_vm3, %v2208_v9, -inf }
 0x8f9   : > { %2213 = vmax.xlane.f32.xlu0 %v2212_v13 }
 0x97e   : > { %v2211_v14 = vpop.xlane.xlu0 %2210 }
 0x97f   : > { %v2215_v15 = vsub.f32 %v2207_v3, %v2211_v14 }
 0x981   : > { %v2217_v19 = vmul.f32 1.442695, %v2215_v15  ;;  %v3173_v15 = vld [vmem:[#allocation25] ss:$0 sm:$0xff] }
 0x982   : > { %v2214_v16 = vpop.xlane.xlu0 %2213 }
 0x983   : > { %v2216_v17 = vsub.f32 %v2208_v9, %v2214_v16 }
 0x985   : > { %v2219_v11 = vmul.f32 1.442695, %v2216_v17  ;;  %v3174_v17 = vld [vmem:[#allocation26] ss:$0 sm:$0xff] }
 0x987   : > { %3644 = vpow2.f32 %v2219_v11 }
 0x988   : > { %3646 = vpow2.f32 %v2217_v19 }
 0x994   : > { %v3645_v20 = vpop.eup %3644 }
 0x995   : > { %v2224_v21 = vsel %vm1465_vm3, %v3645_v20, 0.0  ;;  %v3647_v23 = vpop.eup %3646 }
 0x996   : > { %2225 = vadd.xlane.f32.xlu0 %v2224_v21  ;;  %v2221_v7 = vsel %vm1465_vm3, %v3647_v23, 0.0 }
 0x99a   : > { %2222 = vadd.xlane.f32.xlu0 %v2221_v7 }
 0x9b0   : > { %2311 = vrot.lane.b32.xlu0 %v4653_v61, %s4195_s26  ;;  %s4821_s26 = scalar_lea.hbm %s4955_s30, %s3188_s0 }
 0xa1f   : > { %v2226_v35 = vpop.xlane.xlu0 %2225 }
 0xa20   : > { %3648 = vrcp.f32 %v2226_v35  ;;  %v2702_v35 = vld [vmem:[%s4887_s21 + $0x18] sm:$0xff] }
 0xa23   : > { %v2223_v24 = vpop.xlane.xlu0 %2222 }
 0xa24   : > { %3650 = vrcp.f32 %v2223_v24  ;;  %v2701_v24 = vld [vmem:[%s4887_s21 + $0x10] sm:$0xff] }
 0xa27   : > { %v2312_v48 = vpop.permute.xlu0 %2311 }
 0xa28   : > { %3344 = vmatpush3.msra.mxu1 %v2312_v48  ;;  %v2699_v48 = vld [vmem:[%s4887_s21] sm:$0xff] }
 0xa29   : > { %3355 = vmatprep.subr.mxu1 %v1309_v27 }
 0xa2d   : > { %v3649_v29 = vpop.eup %3648 }
 0xa2e   : > { %v2230_v58 = vmul.f32 %v3649_v29, %v3645_v20  ;;  %v3175_v29 = vld [vmem:[%s4886_s20] ss:$0 sm:$0xff] }
 0xa30   : > { %v2232_v30 = vmul.f32 %v2230_v58, %v4682_v59 }
 0xa31   : > { %v3651_v33 = vpop.eup %3650 }
 0xa32   : > { %3346 = vmatmul.mubr.msk.f32.vlgmr.msra.gmra.mxu1 %vm1465_vm3, %v2232_v30  ;;  %v2229_v36 = vmul.f32 %v3651_v33, %v3647_v23 }
 0xa33   : > { %3356 = vmatpush3.msra.mxu1 %v1309_v27  ;;  %3359 = vmatprep.mubr.msk.f32.mxu1 %vm1312_vm2, %v4708_v6  ;;  %v2700_v27 = vld [vmem:[%s4887_s21 + $0x8] sm:$0xff] }
 0xa34   : > { %3357 = vmatprep.subr.mxu1 %v1308_v34  ;;  %v2231_v61 = vmul.f32 %v2229_v36, %v4682_v59 }
 0xa35   : > { %3358 = vmatpush3.msra.mxu1 %v1308_v34 }
 0xa36   : > { %3341 = vmatmul.mubr.msk.f32.vlgmr.msra.gmra.mxu0 %vm1465_vm3, %v2231_v61  ;;  %3360 = vmatmul.mubr.msk.f32.vlgmr.msra.gmra.mxu1 %vm1312_vm2, %v4706_v4 }
 0xa37   : > { %3349 = vmatpush3.msra.mxu0 %v1311_v37  ;;  %3373 = vmatprep.subr.mxu1 %v2706_v0 }
 0xa38   : > { %3350 = vmatprep.subr.mxu0 %v1310_v38  ;;  %3374 = vmatpush3.msra.mxu1 %v2706_v0 }
 0xa39   : > { %3351 = vmatpush3.msra.mxu0 %v1310_v38  ;;  %3375 = vmatprep.subr.mxu1 %v2705_v1  ;;  %v3178_v38 = vld [vmem:[%s4888_s22] ss:$0 sm:$0xff] }
 0xa3a   : > { %3376 = vmatpush3.msra.mxu1 %v2705_v1 }
 0xa3b   : > { %3377 = vmatprep.subr.mxu1 %v2704_v25 }
 0xa3c   : > { %3378 = vmatpush3.msra.mxu1 %v2704_v25 }
 0xa3d   : > { %3379 = vmatprep.subr.mxu1 %v2703_v2 }
 0xa3e   : > { %3380 = vmatpush3.msra.mxu1 %v2703_v2 }
 0xa3f   : > { %3381 = vmatprep.subr.mxu1 %v2702_v35 }
 0xa40   : > { %3382 = vmatpush3.msra.mxu1 %v2702_v35 }
 0xa41   : > { %3383 = vmatprep.subr.mxu1 %v2701_v24 }
 0xa42   : > { %3384 = vmatpush3.msra.mxu1 %v2701_v24 }
 0xa43   : > { %3385 = vmatprep.subr.mxu1 %v2700_v27 }
 0xa44   : > { %3386 = vmatpush3.msra.mxu1 %v2700_v27 }
 0xa45   : > { %3387 = vmatprep.subr.mxu1 %v2699_v48 }
 0xa46   : > { %3388 = vmatpush3.msra.mxu1 %v2699_v48 }
 0xaf2   : > { %v2383_v39 = vpop.f32.mrf.mxu1 }
 0xaf4   : > { %v3347_v40 = vpop.f32.mrf.mxu1 }
 0xaf6   : > { %v2306_v41 = vpop.f32.mrf.mxu0  ;;  %v3361_v59 = vpop.f32.mrf.mxu1 }
 0xaf7   : > { %3352 = vmatprep.mubr.msk.f32.mxu0 %vm1312_vm2, %v2306_v41 }
 0xaf8   : > { %v3342_v6 = vpop.f32.mrf.mxu0  ;;  %3353 = vmatmul.mubr.msk.f32.vlgmr.msra.gmra.mxu0 %vm1312_vm2, %v2383_v39  ;;  %v2540_v44 = vpop.f32.mrf.mxu1 }
 0xbb8   : > { %v3354_v42 = vpop.f32.mrf.mxu0 }
 0xbb9   : > { %v2546_v32 = vadd.f32 %v3361_v59, %v3354_v42 }
 0xbba   : > { %v2459_v4 = vpop.f32.mrf.mxu0 }
 0xbbb   : > { %v2557_v45 = vadd.f32 %v3172_v43, %v2546_v32  ;;  %v2541_v31 = vadd.f32 %v2540_v44, %v2459_v4 }
 0xbbd   : > { %v2556_v46 = vadd.f32 %v3172_v43, %v2541_v31  ;;  %v2559_v49 = vadd.f32 %v2557_v45, %v4580_v12 }
 0xbbf   : > { %v2565_v50 = vsel %vm1036_vm0, %v2559_v49, 0.0  ;;  %v2558_v53 = vadd.f32 %v2556_v46, %v4578_v10  ;;  %v2608_v10 = vld [vmem:[%s4885_s19 + $0x18] sm:$0xff] }
 0xbc0   : > { %2566 = vadd.xlane.f32.xlu0 %v2565_v50  ;;  %3362 = vmatprep.subr.mxu0 %v2608_v10 }
 0xbc1   : > { %v2562_v51 = vsel %vm1036_vm0, %v2558_v53, 0.0  ;;  %3363 = vmatpush3.msra.mxu0 %v2608_v10 }
 0xbc2   : > { %2563 = vadd.xlane.f32.xlu1 %v2562_v51  ;;  %3364 = vmatprep.subr.mxu0 %v2607_v57 }
 0xbc3   : > { %3365 = vmatpush3.msra.mxu0 %v2607_v57 }
 0xbc4   : > { %3366 = vmatprep.subr.mxu0 %v2606_v60 }
 0xbc5   : > { %3367 = vmatpush3.msra.mxu0 %v2606_v60 }
 0xbc6   : > { %3368 = vmatprep.subr.mxu0 %v2605_v63 }
 0xbc7   : > { %3369 = vmatpush3.msra.mxu0 %v2605_v63 }
 0xc49   : > { %v2567_v52 = vpop.xlane.xlu0 %2566 }
 0xc4a   : > { %v2570_v18 = vmul.f32 0.03125, %v2567_v52 }
 0xc4b   : > { %v2564_v26 = vpop.xlane.xlu1 %2563 }
 0xc4c   : > { %v2569_v22 = vmul.f32 0.03125, %v2564_v26  ;;  %v2572_v28 = vsub.f32 %v2559_v49, %v2570_v18 }
 0xc4e   : > { %v2571_v54 = vsub.f32 %v2558_v53, %v2569_v22  ;;  %v2574_v62 = vmul.f32 %v2572_v28, %v2572_v28 }
 0xc50   : > { %v2573_v55 = vmul.f32 %v2571_v54, %v2571_v54  ;;  %v2578_v12 = vsel %vm1036_vm0, %v2574_v62, 0.0 }
 0xc52   : > { %v2575_v56 = vsel %vm1036_vm0, %v2573_v55, 0.0 }
 0xc53   : > { %2576 = vadd.xlane.f32.xlu1 %v2575_v56  ;;  %v3181_v56 = vld [vmem:[%s4889_s23] ss:$0 sm:$0xff] }
 0xc57   : > { %2579 = vadd.xlane.f32.xlu1 %v2578_v12  ;;  %v3182_v12 = vld [vmem:[%s4890_s24] ss:$0 sm:$0xff] }
 0xcdc   : > { %v2577_v3 = vpop.xlane.xlu1 %2576 }
 0xcdd   : > { %v2581_v5 = vmul.f32 0.03125, %v2577_v3 }
 0xcdf   : > { %v2583_v8 = vadd.f32 1e-05, %v2581_v5 }
 0xce0   : > { %v2580_v47 = vpop.xlane.xlu1 %2579 }
 0xce1   : > { %3652 = vrsqrt.f32 %v2583_v8  ;;  %v2582_v9 = vmul.f32 0.03125, %v2580_v47 }
 0xce3   : > { %v2584_v13 = vadd.f32 1e-05, %v2582_v9 }
 0xce5   : > { %3654 = vrsqrt.f32 %v2584_v13 }
 0xcee   : > { %v3653_v14 = vpop.eup %3652 }
 0xcef   : > { %v2587_v16 = vmul.f32 %v3653_v14, %v2571_v54 }
 0xcf1   : > { %v2595_v19 = vmul.f32 %v3173_v15, %v2587_v16 }
 0xcf2   : > { %v3655_v11 = vpop.eup %3654 }
 0xcf3   : > { %v2588_v20 = vmul.f32 %v3655_v11, %v2572_v28  ;;  %v2603_v21 = vadd.f32 %v3174_v17, %v2595_v19 }
 0xcf5   : > { %v2596_v23 = vmul.f32 %v3173_v15, %v2588_v20  ;;  %3370 = vmatprep.mubr.msk.f32.mxu0 %vm1036_vm0, %v2603_v21 }
 0xcf7   : > { %v2604_v7 = vadd.f32 %v3174_v17, %v2596_v23 }
 0xcf9   : > { %3371 = vmatmul.mubr.msk.f32.vlgmr.msra.gmra.mxu0 %vm1036_vm0, %v2604_v7 }
 0xdb9   : > { %v3372_v58 = vpop.f32.mrf.mxu0 }
 0xdba   : > { %v2694_v30 = vadd.f32 %v3372_v58, %v3175_v29 }
 0xdbb   : > { %v2688_v33 = vpop.f32.mrf.mxu0 }
 0xdbc   : > { %v2689_v34 = vadd.f32 %v3175_v29, %v2688_v33  ;;  %v2698_v61 = vmax.f32 %v2694_v30, 0.0 }
 0xdbe   : > { %v2697_v36 = vmax.f32 %v2689_v34, 0.0 }
 0xdc0   : > { %3389 = vmatprep.mubr.msk.f32.mxu1 %vm2714_vm12, %v2697_v36 }
 0xdc1   : > { %3390 = vmatmul.mubr.msk.f32.vlgmr.msra.gmra.mxu1 %vm2714_vm12, %v2698_v61 }
 0xe81   : > { %v3391_v37 = vpop.f32.mrf.mxu1 }
 0xe82   : > { %v2793_v40 = vadd.f32 %v3391_v37, %v3178_v38 }
 0xe83   : > { %v2787_v39 = vpop.f32.mrf.mxu1 }
 0xe84   : > { %v2788_v41 = vadd.f32 %v3178_v38, %v2787_v39  ;;  %v2797_v42 = vadd.f32 %v2793_v40, %v2604_v7 }
 0xe86   : > { %v2796_v6 = vadd.f32 %v2788_v41, %v2603_v21  ;;  %v2803_v43 = vsel %vm1036_vm0, %v2797_v42, 0.0 }
 0xe88   : > { %v2800_v59 = vsel %vm1036_vm0, %v2796_v6, 0.0 }
 0xe89   : > { %2801 = vadd.xlane.f32.xlu1 %v2800_v59 }
 0xe8d   : > { %2804 = vadd.xlane.f32.xlu1 %v2803_v43 }
 0xf12   : > { %v2802_v32 = vpop.xlane.xlu1 %2801 }
 0xf13   : > { %v2806_v44 = vmul.f32 0.03125, %v2802_v32 }
 0xf15   : > { %v2808_v4 = vsub.f32 %v2796_v6, %v2806_v44 }
 0xf16   : > { %v2805_v45 = vpop.xlane.xlu1 %2804 }
 0xf17   : > { %v2807_v31 = vmul.f32 0.03125, %v2805_v45  ;;  %v2810_v46 = vmul.f32 %v2808_v4, %v2808_v4 }
 0xf19   : > { %v2809_v49 = vsub.f32 %v2797_v42, %v2807_v31  ;;  %v2812_v50 = vsel %vm1036_vm0, %v2810_v46, 0.0 }
 0xf1a   : > { %2813 = vadd.xlane.f32.xlu0 %v2812_v50 }
 0xf1b   : > { %v2811_v53 = vmul.f32 %v2809_v49, %v2809_v49 }
 0xf1d   : > { %v2815_v51 = vsel %vm1036_vm0, %v2811_v53, 0.0 }
 0xf1e   : > { %2816 = vadd.xlane.f32.xlu1 %v2815_v51 }
 0xfa3   : > { %v2814_v52 = vpop.xlane.xlu0 %2813 }
 0xfa4   : > { %v2818_v18 = vmul.f32 0.03125, %v2814_v52 }
 0xfa6   : > { %v2820_v26 = vadd.f32 1e-05, %v2818_v18 }
 0xfa7   : > { %v2817_v22 = vpop.xlane.xlu1 %2816 }
 0xfa8   : > { %3656 = vrsqrt.f32 %v2820_v26  ;;  %v2819_v28 = vmul.f32 0.03125, %v2817_v22 }
 0xfaa   : > { %v2821_v54 = vadd.f32 1e-05, %v2819_v28 }
 0xfac   : > { %3658 = vrsqrt.f32 %v2821_v54 }
 0xfb5   : > { %v3657_v55 = vpop.eup %3656 }
 0xfb6   : > { %v2824_v62 = vmul.f32 %v3657_v55, %v2808_v4 }
 0xfb8   : > { %v2832_v10 = vmul.f32 %v3181_v56, %v2824_v62 }
 0xfb9   : > { %v3659_v57 = vpop.eup %3658 }
 0xfba   : > { %v2840_v60 = vadd.f32 %v3182_v12, %v2832_v10  ;;  %v2825_v63 = vmul.f32 %v3659_v57, %v2809_v49 }
 0xfbc   : > { %v2833_v0 = vmul.f32 %v3181_v56, %v2825_v63  ;;  %2842 = vst.msk [vmem:[%s999_s3] sm:$0xff] %vm1036_vm0, %v2840_v60 }
 0xfbe   : > { %v2841_v1 = vadd.f32 %v3182_v12, %v2833_v0 }
 0xfc0   : > { %2843 = vst.msk [vmem:[%s999_s3 + $0x8] sm:$0xff] %vm1036_vm0, %v2841_v1 }
 0xfc1   : > { %4089 = shalt.err (!%p4086_p3)
}
 0xfc2   : > { %s4090_s9 = scalar_lea.hbm %s4821_s26, 256  ;;  %s4094_s3 = scalar_lea.hbm %s4956_s27, 512 }
 0xfc3   : > { %p4091_p9 = scmp.ne.s32.totalorder %s4821_s26, %s4090_s9  ;;  %p4095_p5 = scmp.lt.s32.totalorder %s4821_s26, %s4956_s27 }
 0xfc4   : > { %p4096_p6 = scmp.lt.s32.totalorder %s4094_s3, %s4090_s9 }
 0xfc5   : > { %p4092_p4 = pnand %p4091_p9, %p4957_p7 }
 0xfc6   : > { %p4097_p10 = por %p4096_p6, %p4095_p5 }
 0xfc7   : > { %p4093_p13 = pneg %p4092_p4 }
 0xfc9   : > { %p4098_p12 = pnand %p4097_p10, %p4093_p13 }
 0xfcb   : > { %4101 = shalt.err (!%p4098_p12)
}
 0xfcc   : > { %s4198_s30 = smov 128   ;;  %s4199_s7 = smov 8  }
 0xfcd   : > { %3456 = dma.vmem_to_hbm [thread:$0]  (%p4957_p7), %s4823_s25, 256, %s4821_s26, %s4826_s8, %s4198_s30, %s4198_s30, %s4199_s7  }
 0xfce PF: > { %s4958_s29 = sld [smem:[#allocation41_spill]] }
 0xfcf   : > { %s4959_s10 = sld [smem:[#allocation39_spill]] }
 0xfd0   : > { %s4960_s1 = sld [smem:[#allocation44_spill]] }
 0xfd4   : > { %p3543_p8 = scmp.ge.s32.totalorder %s4958_s29, 2 }
 0xfd5   : > { %s2873_s28 = sand.u32 1, %s4959_s10  }
 0xfd6   : > { %p4961_p11 = scmp.ne.s32.totalorder %s4960_s1, 0  ;;  %s2874_s9 = scalar_lea.sflag [#allocation4], %s2873_s28 }
 0xfd8   : > { %p3508_p0 = pnand %p3543_p8, %p4961_p11 }
 0xfda   : > { %p3509_p1 = pneg %p3508_p0 }
 0xfdc   : > { %4155 = dma.done.wait (%p3509_p1), %s2874_s9, 256  }
 0xfdd   : > { %4157 = vsyncadd (%p3509_p1), %s2874_s9, 4294967040  ;;  %s4962_s30 = sld [smem:[#allocation42_spill]]  ;;  %s4965_s29 = smov %s4164_s2 }
 0xfde   : > { %s4963_s0 = sld [smem:[#allocation40_spill]] }
 0xfdf   : > { %s4964_s6 = sld [smem:[#allocation43_spill]] }
 0xfe3   : > { %p44_p2 = scmp.ge.s32.totalorder %s4962_s30, 4  }
 0xfe4   : > { %s4966_s2 = smov %s4963_s0 }
 0xfe5   :  { %46 = sbr.rel (!%p44_p2) target bundleno = 25 (0x19), region = 226 }
 0xfea   :  { %2879 = vsyncpa [#allocation3], 1 }
 0xfeb   :  { %2881 = vsyncpa [#allocation3 + $0x1], 1 }
 0xfec   :  { %2882 = vsyncpa [#allocation6], 1 }
 0xfed   :  { %2883 = vsyncpa [#allocation9], 1 }
 0xfee   :  { %2884 = vsyncpa [#allocation12], 1 }
 0xfef   :  { %2885 = vsyncpa [#allocation15], 1 }
 0xff0   :  { %2886 = vsyncpa [#allocation18], 1 }
 0xff1   :  { %2887 = vsyncpa [#allocation21], 1 }
 0xff2   :  { %2888 = vsyncpa [#allocation24], 1 }
 0xff3   :  { %2889 = vsyncpa [#allocation27], 1 }
 0xff4   :  { %2890 = vsyncpa [#allocation4], 1 }
 0xff5   :  { %2892 = vsyncpa [#allocation4 + $0x1], 1 }

</bundles_post_ra>
